<compile_context>
chip_gen: v7x
topology: tpu7x:2x2x1
jax: 0.10.0
libtpu: 0.0.40
codegen_flags: <defaults>
</compile_context>

<pallas_src>
import functools

import jax
import jax.numpy as jnp
from jax.experimental import pallas as pl
from jax.experimental.pallas import tpu as pltpu

EPS = 1e-12  # F.normalize default eps  (1/max(||x||, eps) == rsqrt(max(||x||^2, eps^2)))


# ----------------------------------------------------------------------------
# Fused per-layer kernel:  x <- x + Attention(RMSNorm(x))
#                          x <- x + FeedForward(RMSNorm(x), scale/shift(t))
# Grid axis 0 = depth ("arbitrary"); residual stream carried in xs_ref (VMEM f32).
# ----------------------------------------------------------------------------
def fused_layer_kernel(x_ref, g_ref, wqkv_ref, qs_ref, ks_ref, woa_ref,
                       win_ref, wof_ref, ss_ref, o_ref, xs_ref,
                       *, B, N, heads, dim_head, attn_scale):
    d = pl.program_id(0)
    depth = pl.num_programs(0)
    BN = B * N
    D = x_ref.shape[-1]
    H = heads * dim_head
    DH = win_ref.shape[-1]

    @pl.when(d == 0)
    def _():
        # load the residual stream once; it stays VMEM-resident across all layers
        xs_ref[...] = x_ref[...].astype(jnp.float32).reshape(BN, D)

    x = xs_ref[...]                                       # (BN, D) f32

    # ---------------- Attention sub-block ----------------
    g = g_ref[0, 0]                                       # (D,)
    inv = jax.lax.rsqrt(jnp.maximum(jnp.sum(x * x, axis=-1, keepdims=True), EPS * EPS))
    xn = x * inv * (g * (D ** 0.5))                       # RMSNorm (scaled), f32

    qkv = jnp.dot(xn.astype(jnp.bfloat16), wqkv_ref[0],   # (BN, 3H), bf16 MXU, f32 acc
                  preferred_element_type=jnp.float32)

    # hoisted broadcasts of the per-head q/k scales (JAX does not CSE broadcasts)
    qs_b = jnp.broadcast_to(qs_ref[0, 0], (BN, dim_head))
    ks_b = jnp.broadcast_to(ks_ref[0, 0], (BN, dim_head))
    woa = woa_ref[0]                                      # (H, D) bf16

    acc = jnp.zeros((BN, D), jnp.float32)
    for h in range(heads):                                # static unroll (heads is small)
        q = qkv[:, h * dim_head:(h + 1) * dim_head]               # (BN, dh)
        k = qkv[:, H + h * dim_head:H + (h + 1) * dim_head]
        v = qkv[:, 2 * H + h * dim_head:2 * H + (h + 1) * dim_head]

        q = q * jax.lax.rsqrt(jnp.maximum(jnp.sum(q * q, -1, keepdims=True),
                                          EPS * EPS)) * qs_b
        k = k * jax.lax.rsqrt(jnp.maximum(jnp.sum(k * k, -1, keepdims=True),
                                          EPS * EPS)) * ks_b

        qb = q.reshape(B, N, dim_head).astype(jnp.bfloat16)
        kb = k.reshape(B, N, dim_head).astype(jnp.bfloat16)
        vb = v.reshape(B, N, dim_head).astype(jnp.bfloat16)

        sim = jnp.einsum("bid,bjd->bij", qb, kb,
                         preferred_element_type=jnp.float32) * attn_scale
        # max-subtraction kept: q_scale/k_scale are learnable, so sim is not strictly bounded
        sim = sim - jnp.max(sim, axis=-1, keepdims=True)
        e = jnp.exp(sim)                                   # f32 softmax
        attn = e * pl.reciprocal(jnp.sum(e, axis=-1, keepdims=True), approx=True)

        oh = jnp.einsum("bij,bjd->bid", attn.astype(jnp.bfloat16), vb,
                        preferred_element_type=jnp.float32)        # (B, N, dh)
        oh = oh.reshape(BN, dim_head)
        # accumulate this head straight into the out-projection (no concat)
        acc = acc + jnp.dot(oh.astype(jnp.bfloat16),
                            woa[h * dim_head:(h + 1) * dim_head, :],
                            preferred_element_type=jnp.float32)

    x = x + acc                                            # attention residual

    # ---------------- FeedForward sub-block ----------------
    invf = jax.lax.rsqrt(jnp.maximum(jnp.sum(x * x, axis=-1, keepdims=True), EPS * EPS))
    xnf = x * invf * (D ** 0.5)                            # RMSNorm (scale=False)

    hmid = jnp.dot(xnf.astype(jnp.bfloat16), win_ref[0],
                   preferred_element_type=jnp.float32)     # (BN, DH)
    hmid = hmid * jax.nn.sigmoid(hmid)                     # SiLU in f32

    ss = ss_ref[0]                                         # (B, 2*DH), precomputed in JAX
    scale = ss[:, :DH]
    shift = ss[:, DH:]
    h3 = hmid.reshape(B, N, DH)
    h3 = h3 * (scale[:, None, :] + 1.0) + shift[:, None, :]
    hmid = h3.reshape(BN, DH)

    x = x + jnp.dot(hmid.astype(jnp.bfloat16), wof_ref[0],
                    preferred_element_type=jnp.float32)    # FF residual

    xs_ref[...] = x                                        # carry to next layer

    @pl.when(d == depth - 1)
    def _():
        o_ref[...] = x.reshape(B, N, D).astype(o_ref.dtype)


# ----------------------------------------------------------------------------
# Wrapper: one pallas_call for the whole depth loop.
# ----------------------------------------------------------------------------
def transformer_forward(x, t, params, *, heads, dim_head):
    B, N, D = x.shape
    depth = params["wqkv"].shape[0]
    H = heads * dim_head
    DH = params["win"].shape[-1]

    # Hoisted time conditioning: silu(t) @ W_ss + b_ss per layer (tiny M=B matmul).
    ta = jax.nn.silu(t.astype(jnp.float32))
    ss = jnp.einsum("bc,dcf->dbf", ta, params["wss"]) + params["bss"]   # (depth, B, 2*DH)

    kern = functools.partial(fused_layer_kernel, B=B, N=N, heads=heads,
                             dim_head=dim_head, attn_scale=8.0)
    return pl.pallas_call(
        kern,
        out_shape=jax.ShapeDtypeStruct((B, N, D), x.dtype),
        grid=(depth,),
        in_specs=[
            pl.BlockSpec((B, N, D), lambda d: (0, 0, 0)),          # x (resident)
            pl.BlockSpec((1, 1, D), lambda d: (d, 0, 0)),          # g
            pl.BlockSpec((1, D, 3 * H), lambda d: (d, 0, 0)),      # W_qkv (bf16)
            pl.BlockSpec((1, 1, dim_head), lambda d: (d, 0, 0)),   # q_scale
            pl.BlockSpec((1, 1, dim_head), lambda d: (d, 0, 0)),   # k_scale
            pl.BlockSpec((1, H, D), lambda d: (d, 0, 0)),          # W_out (attn, bf16)
            pl.BlockSpec((1, D, DH), lambda d: (d, 0, 0)),         # W_in  (ff, bf16)
            pl.BlockSpec((1, DH, D), lambda d: (d, 0, 0)),         # W_out (ff, bf16)
            pl.BlockSpec((1, B, 2 * DH), lambda d: (d, 0, 0)),     # scale/shift (hoisted)
        ],
        out_specs=pl.BlockSpec((B, N, D), lambda d: (0, 0, 0)),
        scratch_shapes=[pltpu.VMEM((B * N, D), jnp.float32)],      # residual stream
        compiler_params=pltpu.CompilerParams(
            dimension_semantics=("arbitrary",),    # state carried across the depth axis
            vmem_limit_bytes=32 * 1024 * 1024,
        ),
    )(x, params["g"], params["wqkv"], params["q_scale"], params["k_scale"],
      params["wout_attn"], params["win"], params["wout_ff"], ss)


# ----------------------------------------------------------------------------
# Pure-JAX reference (mirrors the kernel's bf16 matmul operands, f32 everywhere else)
# ----------------------------------------------------------------------------
def ref_forward(x, t, params, *, heads, dim_head):
    B, N, D = x.shape
    depth = params["wqkv"].shape[0]
    H = heads * dim_head
    DH = params["win"].shape[-1]
    f32, bf16 = jnp.float32, jnp.bfloat16

    def dotf(a, b):
        return jnp.dot(a.astype(bf16), b.astype(bf16), preferred_element_type=f32)

    def inv_norm(v):
        return jax.lax.rsqrt(jnp.maximum(jnp.sum(v * v, -1, keepdims=True), EPS * EPS))

    x = x.astype(f32)
    ta = jax.nn.silu(t.astype(f32))
    for l in range(depth):
        # attention
        xn = x * inv_norm(x) * (params["g"][l, 0] * (D ** 0.5))
        qkv = dotf(xn.reshape(B * N, D), params["wqkv"][l]).reshape(B, N, 3 * H)
        q, k, v = jnp.split(qkv, 3, axis=-1)
        resh = lambda a: a.reshape(B, N, heads, dim_head).transpose(0, 2, 1, 3)
        q, k, v = resh(q), resh(k), resh(v)
        q = q * inv_norm(q) * params["q_scale"][l, 0]
        k = k * inv_norm(k) * params["k_scale"][l, 0]
        sim = jnp.einsum("bhid,bhjd->bhij", q.astype(bf16), k.astype(bf16),
                         preferred_element_type=f32) * 8.0
        sim = sim - jnp.max(sim, -1, keepdims=True)
        e = jnp.exp(sim)
        attn = e / jnp.sum(e, -1, keepdims=True)
        o = jnp.einsum("bhij,bhjd->bhid", attn.astype(bf16), v.astype(bf16),
                       preferred_element_type=f32)
        o = o.transpose(0, 2, 1, 3).reshape(B * N, H)
        x = x + dotf(o, params["wout_attn"][l]).reshape(B, N, D)

        # feedforward
        xn = x * inv_norm(x) * (D ** 0.5)
        h = dotf(xn.reshape(B * N, D), params["win"][l]).reshape(B, N, DH)
        h = h * jax.nn.sigmoid(h)
        ss = ta @ params["wss"][l] + params["bss"][l]          # (B, 2*DH) f32
        scale, shift = ss[:, :DH], ss[:, DH:]
        h = h * (scale[:, None, :] + 1.0) + shift[:, None, :]
        x = x + dotf(h.reshape(B * N, DH), params["wout_ff"][l]).reshape(B, N, D)
    return x


# ----------------------------------------------------------------------------
# Deterministic parameter initialization (depth-stacked; matmul weights stored bf16)
# ----------------------------------------------------------------------------
def init_params(key, *, depth, dim, cond_dim, heads, dim_head, ff_mult):
    H = heads * dim_head
    DH = dim * ff_mult
    ks = jax.random.split(key, 6)
    f32, bf16 = jnp.float32, jnp.bfloat16
    # NOTE: PyTorch zero-inits the scale/shift linear; small random values are used here
    # so that code path is actually exercised.
    return {
        "g": jnp.ones((depth, 1, dim), f32),
        "wqkv": (0.05 * jax.random.normal(ks[0], (depth, dim, 3 * H), f32)).astype(bf16),
        "q_scale": jnp.ones((depth, 1, dim_head), f32),
        "k_scale": jnp.ones((depth, 1, dim_head), f32),
        "wout_attn": (0.05 * jax.random.normal(ks[1], (depth, H, dim), f32)).astype(bf16),
        "win": (0.05 * jax.random.normal(ks[2], (depth, dim, DH), f32)).astype(bf16),
        "wss": 0.05 * jax.random.normal(ks[3], (depth, cond_dim, 2 * DH), f32),
        "bss": 0.05 * jax.random.normal(ks[4], (depth, 1, 2 * DH), f32),
        "wout_ff": (0.05 * jax.random.normal(ks[5], (depth, DH, dim), f32)).astype(bf16),
    }


if __name__ == "__main__":
    # small shapes consistent with the module
    B, N, DIM = 2, 8, 32
    HEADS, DIM_HEAD = 4, 32
    TIME_COND_DIM = 16
    FF_MULT = 4
    DEPTH = 2

    key = jax.random.PRNGKey(0)
    kx, kt, kp = jax.random.split(key, 3)
    x = jax.random.normal(kx, (B, N, DIM), jnp.float32)
    t = jax.random.normal(kt, (B, TIME_COND_DIM), jnp.float32)
    params = init_params(kp, depth=DEPTH, dim=DIM, cond_dim=TIME_COND_DIM,
                         heads=HEADS, dim_head=DIM_HEAD, ff_mult=FF_MULT)

    fwd = jax.jit(functools.partial(transformer_forward, heads=HEADS, dim_head=DIM_HEAD))
    out = jax.block_until_ready(fwd(x, t, params))

    ref = ref_forward(x, t, params, heads=HEADS, dim_head=DIM_HEAD)
    assert out.shape == (B, N, DIM)
    # tolerance covers approx-reciprocal softmax denom + accumulation-order differences
    assert jnp.allclose(out, ref.astype(out.dtype), atol=5e-3, rtol=5e-3), \
        "mismatch vs JAX reference"

    print("KERNEL_OK")
</pallas_src>

<mosaic_0001>
module attributes {stable_mosaic.version = 11 : i64} {
  func.func @fused_layer_kernel(%arg0: i32, %arg1: memref<2x8x32xf32, #tpu.memory_space<vmem>>, %arg2: memref<1x1x32xf32, #tpu.memory_space<vmem>>, %arg3: memref<1x32x384xbf16, #tpu.memory_space<vmem>>, %arg4: memref<1x1x32xf32, #tpu.memory_space<vmem>>, %arg5: memref<1x1x32xf32, #tpu.memory_space<vmem>>, %arg6: memref<1x128x32xbf16, #tpu.memory_space<vmem>>, %arg7: memref<1x32x128xbf16, #tpu.memory_space<vmem>>, %arg8: memref<1x128x32xbf16, #tpu.memory_space<vmem>>, %arg9: memref<1x2x256xf32, #tpu.memory_space<vmem>>, %arg10: memref<2x8x32xf32, #tpu.memory_space<vmem>>, %arg11: memref<16x32xf32, #tpu.memory_space<vmem>>) attributes {dimension_semantics = [#tpu.dimension_semantics<arbitrary>], iteration_bounds = array<i64: 2>, scalar_prefetch = 0 : i64, scratch_operands = 1 : i64, tpu.core_type = #tpu.core_type<tc>, window_params = [{pipeline_mode = #tpu.pipeline_mode<synchronous>, transform_indices = @transform_0, window_bounds = array<i64: 2, 8, 32>}, {transform_indices = @transform_1, window_bounds = array<i64: 1, 1, 32>}, {transform_indices = @transform_2, window_bounds = array<i64: 1, 32, 384>}, {transform_indices = @transform_3, window_bounds = array<i64: 1, 1, 32>}, {transform_indices = @transform_4, window_bounds = array<i64: 1, 1, 32>}, {transform_indices = @transform_5, window_bounds = array<i64: 1, 128, 32>}, {transform_indices = @transform_6, window_bounds = array<i64: 1, 32, 128>}, {transform_indices = @transform_7, window_bounds = array<i64: 1, 128, 32>}, {transform_indices = @transform_8, window_bounds = array<i64: 1, 2, 256>}, {pipeline_mode = #tpu.pipeline_mode<synchronous>, transform_indices = @transform_9, window_bounds = array<i64: 2, 8, 32>}]} {
    %c0_i32 = arith.constant 0 : i32
    %0 = arith.cmpi eq, %arg0, %c0_i32 : i32
    %1 = arith.extui %0 : i1 to i32
    %c0_i32_0 = arith.constant 0 : i32
    %2 = arith.cmpi ne, %1, %c0_i32_0 : i32
    scf.if %2 {
      %c0_80 = arith.constant 0 : index
      %c0_81 = arith.constant 0 : index
      %c0_82 = arith.constant 0 : index
      %266 = vector.load %arg1[%c0_80, %c0_81, %c0_82] : memref<2x8x32xf32, #tpu.memory_space<vmem>>, vector<2x8x32xf32>
      %267 = vector.shape_cast %266 : vector<2x8x32xf32> to vector<16x32xf32>
      %c0_83 = arith.constant 0 : index
      %c0_84 = arith.constant 0 : index
      %268 = vector.load %arg11[%c0_83, %c0_84] : memref<16x32xf32, #tpu.memory_space<vmem>>, vector<16x32xf32>
      tpu.vector_store %arg11[%c0_83, %c0_84], %267 {strides = array<i32>} : memref<16x32xf32, #tpu.memory_space<vmem>>, vector<16x32xf32>,
    } else {
    }
    %c0 = arith.constant 0 : index
    %c0_1 = arith.constant 0 : index
    %3 = vector.load %arg11[%c0, %c0_1] : memref<16x32xf32, #tpu.memory_space<vmem>>, vector<16x32xf32>
    %c0_2 = arith.constant 0 : index
    %c0_3 = arith.constant 0 : index
    %c0_4 = arith.constant 0 : index
    %4 = vector.load %arg2[%c0_2, %c0_3, %c0_4] : memref<1x1x32xf32, #tpu.memory_space<vmem>>, vector<1x1x32xf32>
    %5 = vector.shape_cast %4 : vector<1x1x32xf32> to vector<32xf32>
    %6 = arith.mulf %3, %3 : vector<16x32xf32>
    %cst = arith.constant dense<0.000000e+00> : vector<16xf32>
    %7 = vector.multi_reduction <add>, %6, %cst [1] : vector<16x32xf32> to vector<16xf32>
    %8 = vector.shape_cast %7 : vector<16xf32> to vector<16x1xf32>
    %cst_5 = arith.constant 1.000000e-24 : f32
    %9 = vector.broadcast %cst_5 : f32 to vector<16x1xf32>
    %10 = arith.maximumf %8, %9 : vector<16x1xf32>
    %11 = math.rsqrt %10 : vector<16x1xf32>
    %12 = vector.broadcast %11 : vector<16x1xf32> to vector<16x32xf32>
    %13 = arith.mulf %3, %12 : vector<16x32xf32>
    %cst_6 = arith.constant 5.65685415 : f32
    %14 = vector.broadcast %cst_6 : f32 to vector<32xf32>
    %15 = arith.mulf %5, %14 : vector<32xf32>
    %16 = vector.shape_cast %15 : vector<32xf32> to vector<1x32xf32>
    %17 = vector.broadcast %16 : vector<1x32xf32> to vector<16x32xf32>
    %18 = arith.mulf %13, %17 : vector<16x32xf32>
    %19 = arith.truncf %18 : vector<16x32xf32> to vector<16x32xbf16>
    %c0_7 = arith.constant 0 : index
    %c0_8 = arith.constant 0 : index
    %c0_9 = arith.constant 0 : index
    %20 = vector.load %arg3[%c0_7, %c0_8, %c0_9] : memref<1x32x384xbf16, #tpu.memory_space<vmem>>, vector<1x32x384xbf16>
    %21 = vector.shape_cast %20 : vector<1x32x384xbf16> to vector<32x384xbf16>
    %cst_10 = arith.constant dense<0.000000e+00> : vector<16x384xf32>
    %22 = tpu.matmul %19, %21, %cst_10 {dimension_numbers = #tpu.dot_dimension_numbers<[1], [0], [0], [1], [0, 0, 1, 1], [], []>} : vector<16x32xbf16>, vector<32x384xbf16>, vector<16x384xf32> -> vector<16x384xf32>
    %c0_11 = arith.constant 0 : index
    %c0_12 = arith.constant 0 : index
    %c0_13 = arith.constant 0 : index
    %23 = vector.load %arg4[%c0_11, %c0_12, %c0_13] : memref<1x1x32xf32, #tpu.memory_space<vmem>>, vector<1x1x32xf32>
    %24 = vector.shape_cast %23 : vector<1x1x32xf32> to vector<32xf32>
    %25 = vector.shape_cast %24 : vector<32xf32> to vector<1x32xf32>
    %26 = vector.broadcast %25 : vector<1x32xf32> to vector<16x32xf32>
    %c0_14 = arith.constant 0 : index
    %c0_15 = arith.constant 0 : index
    %c0_16 = arith.constant 0 : index
    %27 = vector.load %arg5[%c0_14, %c0_15, %c0_16] : memref<1x1x32xf32, #tpu.memory_space<vmem>>, vector<1x1x32xf32>
    %28 = vector.shape_cast %27 : vector<1x1x32xf32> to vector<32xf32>
    %29 = vector.shape_cast %28 : vector<32xf32> to vector<1x32xf32>
    %30 = vector.broadcast %29 : vector<1x32xf32> to vector<16x32xf32>
    %c0_17 = arith.constant 0 : index
    %c0_18 = arith.constant 0 : index
    %c0_19 = arith.constant 0 : index
    %31 = vector.load %arg6[%c0_17, %c0_18, %c0_19] : memref<1x128x32xbf16, #tpu.memory_space<vmem>>, vector<1x128x32xbf16>
    %32 = vector.shape_cast %31 : vector<1x128x32xbf16> to vector<128x32xbf16>
    %cst_20 = arith.constant 0.000000e+00 : f32
    %33 = vector.broadcast %cst_20 : f32 to vector<16x32xf32>
    %34 = vector.extract_strided_slice %22 {offsets = [0, 0], sizes = [16, 32], strides = [1, 1]} : vector<16x384xf32> to vector<16x32xf32>
    %35 = vector.extract_strided_slice %22 {offsets = [0, 128], sizes = [16, 32], strides = [1, 1]} : vector<16x384xf32> to vector<16x32xf32>
    %36 = vector.extract_strided_slice %22 {offsets = [0, 256], sizes = [16, 32], strides = [1, 1]} : vector<16x384xf32> to vector<16x32xf32>
    %37 = arith.mulf %34, %34 : vector<16x32xf32>
    %cst_21 = arith.constant dense<0.000000e+00> : vector<16xf32>
    %38 = vector.multi_reduction <add>, %37, %cst_21 [1] : vector<16x32xf32> to vector<16xf32>
    %39 = vector.shape_cast %38 : vector<16xf32> to vector<16x1xf32>
    %cst_22 = arith.constant 1.000000e-24 : f32
    %40 = vector.broadcast %cst_22 : f32 to vector<16x1xf32>
    %41 = arith.maximumf %39, %40 : vector<16x1xf32>
    %42 = math.rsqrt %41 : vector<16x1xf32>
    %43 = vector.broadcast %42 : vector<16x1xf32> to vector<16x32xf32>
    %44 = arith.mulf %34, %43 : vector<16x32xf32>
    %45 = arith.mulf %44, %26 : vector<16x32xf32>
    %46 = arith.mulf %35, %35 : vector<16x32xf32>
    %cst_23 = arith.constant dense<0.000000e+00> : vector<16xf32>
    %47 = vector.multi_reduction <add>, %46, %cst_23 [1] : vector<16x32xf32> to vector<16xf32>
    %48 = vector.shape_cast %47 : vector<16xf32> to vector<16x1xf32>
    %cst_24 = arith.constant 1.000000e-24 : f32
    %49 = vector.broadcast %cst_24 : f32 to vector<16x1xf32>
    %50 = arith.maximumf %48, %49 : vector<16x1xf32>
    %51 = math.rsqrt %50 : vector<16x1xf32>
    %52 = vector.broadcast %51 : vector<16x1xf32> to vector<16x32xf32>
    %53 = arith.mulf %35, %52 : vector<16x32xf32>
    %54 = arith.mulf %53, %30 : vector<16x32xf32>
    %55 = vector.shape_cast %45 : vector<16x32xf32> to vector<2x8x32xf32>
    %56 = arith.truncf %55 : vector<2x8x32xf32> to vector<2x8x32xbf16>
    %57 = vector.shape_cast %54 : vector<16x32xf32> to vector<2x8x32xf32>
    %58 = arith.truncf %57 : vector<2x8x32xf32> to vector<2x8x32xbf16>
    %59 = vector.shape_cast %36 : vector<16x32xf32> to vector<2x8x32xf32>
    %60 = arith.truncf %59 : vector<2x8x32xf32> to vector<2x8x32xbf16>
    "tpu.trace_start"() <{level = 10 : i32, message = "bid,bjd->bij"}> : () -> ()
    %cst_25 = arith.constant dense<0.000000e+00> : vector<2x8x8xf32>
    %61 = tpu.matmul %56, %58, %cst_25 {dimension_numbers = #tpu.dot_dimension_numbers<[2], [2], [1], [1], [0, 0, 0, 1, 1, 1], [0], [0]>} : vector<2x8x32xbf16>, vector<2x8x32xbf16>, vector<2x8x8xf32> -> vector<2x8x8xf32>
    "tpu.trace_stop"() : () -> ()
    %cst_26 = arith.constant 8.000000e+00 : f32
    %62 = vector.broadcast %cst_26 : f32 to vector<2x8x8xf32>
    %63 = arith.mulf %61, %62 : vector<2x8x8xf32>
    %cst_27 = arith.constant dense<0xFF800000> : vector<2x8xf32>
    %64 = vector.multi_reduction <maximumf>, %63, %cst_27 [2] : vector<2x8x8xf32> to vector<2x8xf32>
    %65 = vector.shape_cast %64 : vector<2x8xf32> to vector<2x8x1xf32>
    %66 = vector.broadcast %65 : vector<2x8x1xf32> to vector<2x8x8xf32>
    %67 = arith.subf %63, %66 : vector<2x8x8xf32>
    %68 = math.exp %67 : vector<2x8x8xf32>
    %cst_28 = arith.constant dense<0.000000e+00> : vector<2x8xf32>
    %69 = vector.multi_reduction <add>, %68, %cst_28 [2] : vector<2x8x8xf32> to vector<2x8xf32>
    %70 = vector.shape_cast %69 : vector<2x8xf32> to vector<2x8x1xf32>
    %71 = tpu.reciprocal %70 {approx = true} : vector<2x8x1xf32> -> vector<2x8x1xf32>
    %72 = vector.broadcast %71 : vector<2x8x1xf32> to vector<2x8x8xf32>
    %73 = arith.mulf %68, %72 : vector<2x8x8xf32>
    %74 = arith.truncf %73 : vector<2x8x8xf32> to vector<2x8x8xbf16>
    "tpu.trace_start"() <{level = 10 : i32, message = "bij,bjd->bid"}> : () -> ()
    %cst_29 = arith.constant dense<0.000000e+00> : vector<2x8x32xf32>
    %75 = tpu.matmul %74, %60, %cst_29 {dimension_numbers = #tpu.dot_dimension_numbers<[2], [1], [1], [2], [0, 0, 0, 1, 1, 2], [0], [0]>} : vector<2x8x8xbf16>, vector<2x8x32xbf16>, vector<2x8x32xf32> -> vector<2x8x32xf32>
    "tpu.trace_stop"() : () -> ()
    %76 = vector.shape_cast %75 : vector<2x8x32xf32> to vector<16x32xf32>
    %77 = arith.truncf %76 : vector<16x32xf32> to vector<16x32xbf16>
    %78 = vector.extract_strided_slice %32 {offsets = [0, 0], sizes = [32, 32], strides = [1, 1]} : vector<128x32xbf16> to vector<32x32xbf16>
    %cst_30 = arith.constant dense<0.000000e+00> : vector<16x32xf32>
    %79 = tpu.matmul %77, %78, %cst_30 {dimension_numbers = #tpu.dot_dimension_numbers<[1], [0], [0], [1], [0, 0, 1, 1], [], []>} : vector<16x32xbf16>, vector<32x32xbf16>, vector<16x32xf32> -> vector<16x32xf32>
    %80 = arith.addf %33, %79 : vector<16x32xf32>
    %81 = vector.extract_strided_slice %22 {offsets = [0, 32], sizes = [16, 32], strides = [1, 1]} : vector<16x384xf32> to vector<16x32xf32>
    %82 = vector.extract_strided_slice %22 {offsets = [0, 160], sizes = [16, 32], strides = [1, 1]} : vector<16x384xf32> to vector<16x32xf32>
    %83 = vector.extract_strided_slice %22 {offsets = [0, 288], sizes = [16, 32], strides = [1, 1]} : vector<16x384xf32> to vector<16x32xf32>
    %84 = arith.mulf %81, %81 : vector<16x32xf32>
    %cst_31 = arith.constant dense<0.000000e+00> : vector<16xf32>
    %85 = vector.multi_reduction <add>, %84, %cst_31 [1] : vector<16x32xf32> to vector<16xf32>
    %86 = vector.shape_cast %85 : vector<16xf32> to vector<16x1xf32>
    %cst_32 = arith.constant 1.000000e-24 : f32
    %87 = vector.broadcast %cst_32 : f32 to vector<16x1xf32>
    %88 = arith.maximumf %86, %87 : vector<16x1xf32>
    %89 = math.rsqrt %88 : vector<16x1xf32>
    %90 = vector.broadcast %89 : vector<16x1xf32> to vector<16x32xf32>
    %91 = arith.mulf %81, %90 : vector<16x32xf32>
    %92 = arith.mulf %91, %26 : vector<16x32xf32>
    %93 = arith.mulf %82, %82 : vector<16x32xf32>
    %cst_33 = arith.constant dense<0.000000e+00> : vector<16xf32>
    %94 = vector.multi_reduction <add>, %93, %cst_33 [1] : vector<16x32xf32> to vector<16xf32>
    %95 = vector.shape_cast %94 : vector<16xf32> to vector<16x1xf32>
    %cst_34 = arith.constant 1.000000e-24 : f32
    %96 = vector.broadcast %cst_34 : f32 to vector<16x1xf32>
    %97 = arith.maximumf %95, %96 : vector<16x1xf32>
    %98 = math.rsqrt %97 : vector<16x1xf32>
    %99 = vector.broadcast %98 : vector<16x1xf32> to vector<16x32xf32>
    %100 = arith.mulf %82, %99 : vector<16x32xf32>
    %101 = arith.mulf %100, %30 : vector<16x32xf32>
    %102 = vector.shape_cast %92 : vector<16x32xf32> to vector<2x8x32xf32>
    %103 = arith.truncf %102 : vector<2x8x32xf32> to vector<2x8x32xbf16>
    %104 = vector.shape_cast %101 : vector<16x32xf32> to vector<2x8x32xf32>
    %105 = arith.truncf %104 : vector<2x8x32xf32> to vector<2x8x32xbf16>
    %106 = vector.shape_cast %83 : vector<16x32xf32> to vector<2x8x32xf32>
    %107 = arith.truncf %106 : vector<2x8x32xf32> to vector<2x8x32xbf16>
    "tpu.trace_start"() <{level = 10 : i32, message = "bid,bjd->bij"}> : () -> ()
    %cst_35 = arith.constant dense<0.000000e+00> : vector<2x8x8xf32>
    %108 = tpu.matmul %103, %105, %cst_35 {dimension_numbers = #tpu.dot_dimension_numbers<[2], [2], [1], [1], [0, 0, 0, 1, 1, 1], [0], [0]>} : vector<2x8x32xbf16>, vector<2x8x32xbf16>, vector<2x8x8xf32> -> vector<2x8x8xf32>
    "tpu.trace_stop"() : () -> ()
    %cst_36 = arith.constant 8.000000e+00 : f32
    %109 = vector.broadcast %cst_36 : f32 to vector<2x8x8xf32>
    %110 = arith.mulf %108, %109 : vector<2x8x8xf32>
    %cst_37 = arith.constant dense<0xFF800000> : vector<2x8xf32>
    %111 = vector.multi_reduction <maximumf>, %110, %cst_37 [2] : vector<2x8x8xf32> to vector<2x8xf32>
    %112 = vector.shape_cast %111 : vector<2x8xf32> to vector<2x8x1xf32>
    %113 = vector.broadcast %112 : vector<2x8x1xf32> to vector<2x8x8xf32>
    %114 = arith.subf %110, %113 : vector<2x8x8xf32>
    %115 = math.exp %114 : vector<2x8x8xf32>
    %cst_38 = arith.constant dense<0.000000e+00> : vector<2x8xf32>
    %116 = vector.multi_reduction <add>, %115, %cst_38 [2] : vector<2x8x8xf32> to vector<2x8xf32>
    %117 = vector.shape_cast %116 : vector<2x8xf32> to vector<2x8x1xf32>
    %118 = tpu.reciprocal %117 {approx = true} : vector<2x8x1xf32> -> vector<2x8x1xf32>
    %119 = vector.broadcast %118 : vector<2x8x1xf32> to vector<2x8x8xf32>
    %120 = arith.mulf %115, %119 : vector<2x8x8xf32>
    %121 = arith.truncf %120 : vector<2x8x8xf32> to vector<2x8x8xbf16>
    "tpu.trace_start"() <{level = 10 : i32, message = "bij,bjd->bid"}> : () -> ()
    %cst_39 = arith.constant dense<0.000000e+00> : vector<2x8x32xf32>
    %122 = tpu.matmul %121, %107, %cst_39 {dimension_numbers = #tpu.dot_dimension_numbers<[2], [1], [1], [2], [0, 0, 0, 1, 1, 2], [0], [0]>} : vector<2x8x8xbf16>, vector<2x8x32xbf16>, vector<2x8x32xf32> -> vector<2x8x32xf32>
    "tpu.trace_stop"() : () -> ()
    %123 = vector.shape_cast %122 : vector<2x8x32xf32> to vector<16x32xf32>
    %124 = arith.truncf %123 : vector<16x32xf32> to vector<16x32xbf16>
    %125 = vector.extract_strided_slice %32 {offsets = [32, 0], sizes = [32, 32], strides = [1, 1]} : vector<128x32xbf16> to vector<32x32xbf16>
    %cst_40 = arith.constant dense<0.000000e+00> : vector<16x32xf32>
    %126 = tpu.matmul %124, %125, %cst_40 {dimension_numbers = #tpu.dot_dimension_numbers<[1], [0], [0], [1], [0, 0, 1, 1], [], []>} : vector<16x32xbf16>, vector<32x32xbf16>, vector<16x32xf32> -> vector<16x32xf32>
    %127 = arith.addf %80, %126 : vector<16x32xf32>
    %128 = vector.extract_strided_slice %22 {offsets = [0, 64], sizes = [16, 32], strides = [1, 1]} : vector<16x384xf32> to vector<16x32xf32>
    %129 = vector.extract_strided_slice %22 {offsets = [0, 192], sizes = [16, 32], strides = [1, 1]} : vector<16x384xf32> to vector<16x32xf32>
    %130 = vector.extract_strided_slice %22 {offsets = [0, 320], sizes = [16, 32], strides = [1, 1]} : vector<16x384xf32> to vector<16x32xf32>
    %131 = arith.mulf %128, %128 : vector<16x32xf32>
    %cst_41 = arith.constant dense<0.000000e+00> : vector<16xf32>
    %132 = vector.multi_reduction <add>, %131, %cst_41 [1] : vector<16x32xf32> to vector<16xf32>
    %133 = vector.shape_cast %132 : vector<16xf32> to vector<16x1xf32>
    %cst_42 = arith.constant 1.000000e-24 : f32
    %134 = vector.broadcast %cst_42 : f32 to vector<16x1xf32>
    %135 = arith.maximumf %133, %134 : vector<16x1xf32>
    %136 = math.rsqrt %135 : vector<16x1xf32>
    %137 = vector.broadcast %136 : vector<16x1xf32> to vector<16x32xf32>
    %138 = arith.mulf %128, %137 : vector<16x32xf32>
    %139 = arith.mulf %138, %26 : vector<16x32xf32>
    %140 = arith.mulf %129, %129 : vector<16x32xf32>
    %cst_43 = arith.constant dense<0.000000e+00> : vector<16xf32>
    %141 = vector.multi_reduction <add>, %140, %cst_43 [1] : vector<16x32xf32> to vector<16xf32>
    %142 = vector.shape_cast %141 : vector<16xf32> to vector<16x1xf32>
    %cst_44 = arith.constant 1.000000e-24 : f32
    %143 = vector.broadcast %cst_44 : f32 to vector<16x1xf32>
    %144 = arith.maximumf %142, %143 : vector<16x1xf32>
    %145 = math.rsqrt %144 : vector<16x1xf32>
    %146 = vector.broadcast %145 : vector<16x1xf32> to vector<16x32xf32>
    %147 = arith.mulf %129, %146 : vector<16x32xf32>
    %148 = arith.mulf %147, %30 : vector<16x32xf32>
    %149 = vector.shape_cast %139 : vector<16x32xf32> to vector<2x8x32xf32>
    %150 = arith.truncf %149 : vector<2x8x32xf32> to vector<2x8x32xbf16>
    %151 = vector.shape_cast %148 : vector<16x32xf32> to vector<2x8x32xf32>
    %152 = arith.truncf %151 : vector<2x8x32xf32> to vector<2x8x32xbf16>
    %153 = vector.shape_cast %130 : vector<16x32xf32> to vector<2x8x32xf32>
    %154 = arith.truncf %153 : vector<2x8x32xf32> to vector<2x8x32xbf16>
    "tpu.trace_start"() <{level = 10 : i32, message = "bid,bjd->bij"}> : () -> ()
    %cst_45 = arith.constant dense<0.000000e+00> : vector<2x8x8xf32>
    %155 = tpu.matmul %150, %152, %cst_45 {dimension_numbers = #tpu.dot_dimension_numbers<[2], [2], [1], [1], [0, 0, 0, 1, 1, 1], [0], [0]>} : vector<2x8x32xbf16>, vector<2x8x32xbf16>, vector<2x8x8xf32> -> vector<2x8x8xf32>
    "tpu.trace_stop"() : () -> ()
    %cst_46 = arith.constant 8.000000e+00 : f32
    %156 = vector.broadcast %cst_46 : f32 to vector<2x8x8xf32>
    %157 = arith.mulf %155, %156 : vector<2x8x8xf32>
    %cst_47 = arith.constant dense<0xFF800000> : vector<2x8xf32>
    %158 = vector.multi_reduction <maximumf>, %157, %cst_47 [2] : vector<2x8x8xf32> to vector<2x8xf32>
    %159 = vector.shape_cast %158 : vector<2x8xf32> to vector<2x8x1xf32>
    %160 = vector.broadcast %159 : vector<2x8x1xf32> to vector<2x8x8xf32>
    %161 = arith.subf %157, %160 : vector<2x8x8xf32>
    %162 = math.exp %161 : vector<2x8x8xf32>
    %cst_48 = arith.constant dense<0.000000e+00> : vector<2x8xf32>
    %163 = vector.multi_reduction <add>, %162, %cst_48 [2] : vector<2x8x8xf32> to vector<2x8xf32>
    %164 = vector.shape_cast %163 : vector<2x8xf32> to vector<2x8x1xf32>
    %165 = tpu.reciprocal %164 {approx = true} : vector<2x8x1xf32> -> vector<2x8x1xf32>
    %166 = vector.broadcast %165 : vector<2x8x1xf32> to vector<2x8x8xf32>
    %167 = arith.mulf %162, %166 : vector<2x8x8xf32>
    %168 = arith.truncf %167 : vector<2x8x8xf32> to vector<2x8x8xbf16>
    "tpu.trace_start"() <{level = 10 : i32, message = "bij,bjd->bid"}> : () -> ()
    %cst_49 = arith.constant dense<0.000000e+00> : vector<2x8x32xf32>
    %169 = tpu.matmul %168, %154, %cst_49 {dimension_numbers = #tpu.dot_dimension_numbers<[2], [1], [1], [2], [0, 0, 0, 1, 1, 2], [0], [0]>} : vector<2x8x8xbf16>, vector<2x8x32xbf16>, vector<2x8x32xf32> -> vector<2x8x32xf32>
    "tpu.trace_stop"() : () -> ()
    %170 = vector.shape_cast %169 : vector<2x8x32xf32> to vector<16x32xf32>
    %171 = arith.truncf %170 : vector<16x32xf32> to vector<16x32xbf16>
    %172 = vector.extract_strided_slice %32 {offsets = [64, 0], sizes = [32, 32], strides = [1, 1]} : vector<128x32xbf16> to vector<32x32xbf16>
    %cst_50 = arith.constant dense<0.000000e+00> : vector<16x32xf32>
    %173 = tpu.matmul %171, %172, %cst_50 {dimension_numbers = #tpu.dot_dimension_numbers<[1], [0], [0], [1], [0, 0, 1, 1], [], []>} : vector<16x32xbf16>, vector<32x32xbf16>, vector<16x32xf32> -> vector<16x32xf32>
    %174 = arith.addf %127, %173 : vector<16x32xf32>
    %175 = vector.extract_strided_slice %22 {offsets = [0, 96], sizes = [16, 32], strides = [1, 1]} : vector<16x384xf32> to vector<16x32xf32>
    %176 = vector.extract_strided_slice %22 {offsets = [0, 224], sizes = [16, 32], strides = [1, 1]} : vector<16x384xf32> to vector<16x32xf32>
    %177 = vector.extract_strided_slice %22 {offsets = [0, 352], sizes = [16, 32], strides = [1, 1]} : vector<16x384xf32> to vector<16x32xf32>
    %178 = arith.mulf %175, %175 : vector<16x32xf32>
    %cst_51 = arith.constant dense<0.000000e+00> : vector<16xf32>
    %179 = vector.multi_reduction <add>, %178, %cst_51 [1] : vector<16x32xf32> to vector<16xf32>
    %180 = vector.shape_cast %179 : vector<16xf32> to vector<16x1xf32>
    %cst_52 = arith.constant 1.000000e-24 : f32
    %181 = vector.broadcast %cst_52 : f32 to vector<16x1xf32>
    %182 = arith.maximumf %180, %181 : vector<16x1xf32>
    %183 = math.rsqrt %182 : vector<16x1xf32>
    %184 = vector.broadcast %183 : vector<16x1xf32> to vector<16x32xf32>
    %185 = arith.mulf %175, %184 : vector<16x32xf32>
    %186 = arith.mulf %185, %26 : vector<16x32xf32>
    %187 = arith.mulf %176, %176 : vector<16x32xf32>
    %cst_53 = arith.constant dense<0.000000e+00> : vector<16xf32>
    %188 = vector.multi_reduction <add>, %187, %cst_53 [1] : vector<16x32xf32> to vector<16xf32>
    %189 = vector.shape_cast %188 : vector<16xf32> to vector<16x1xf32>
    %cst_54 = arith.constant 1.000000e-24 : f32
    %190 = vector.broadcast %cst_54 : f32 to vector<16x1xf32>
    %191 = arith.maximumf %189, %190 : vector<16x1xf32>
    %192 = math.rsqrt %191 : vector<16x1xf32>
    %193 = vector.broadcast %192 : vector<16x1xf32> to vector<16x32xf32>
    %194 = arith.mulf %176, %193 : vector<16x32xf32>
    %195 = arith.mulf %194, %30 : vector<16x32xf32>
    %196 = vector.shape_cast %186 : vector<16x32xf32> to vector<2x8x32xf32>
    %197 = arith.truncf %196 : vector<2x8x32xf32> to vector<2x8x32xbf16>
    %198 = vector.shape_cast %195 : vector<16x32xf32> to vector<2x8x32xf32>
    %199 = arith.truncf %198 : vector<2x8x32xf32> to vector<2x8x32xbf16>
    %200 = vector.shape_cast %177 : vector<16x32xf32> to vector<2x8x32xf32>
    %201 = arith.truncf %200 : vector<2x8x32xf32> to vector<2x8x32xbf16>
    "tpu.trace_start"() <{level = 10 : i32, message = "bid,bjd->bij"}> : () -> ()
    %cst_55 = arith.constant dense<0.000000e+00> : vector<2x8x8xf32>
    %202 = tpu.matmul %197, %199, %cst_55 {dimension_numbers = #tpu.dot_dimension_numbers<[2], [2], [1], [1], [0, 0, 0, 1, 1, 1], [0], [0]>} : vector<2x8x32xbf16>, vector<2x8x32xbf16>, vector<2x8x8xf32> -> vector<2x8x8xf32>
    "tpu.trace_stop"() : () -> ()
    %cst_56 = arith.constant 8.000000e+00 : f32
    %203 = vector.broadcast %cst_56 : f32 to vector<2x8x8xf32>
    %204 = arith.mulf %202, %203 : vector<2x8x8xf32>
    %cst_57 = arith.constant dense<0xFF800000> : vector<2x8xf32>
    %205 = vector.multi_reduction <maximumf>, %204, %cst_57 [2] : vector<2x8x8xf32> to vector<2x8xf32>
    %206 = vector.shape_cast %205 : vector<2x8xf32> to vector<2x8x1xf32>
    %207 = vector.broadcast %206 : vector<2x8x1xf32> to vector<2x8x8xf32>
    %208 = arith.subf %204, %207 : vector<2x8x8xf32>
    %209 = math.exp %208 : vector<2x8x8xf32>
    %cst_58 = arith.constant dense<0.000000e+00> : vector<2x8xf32>
    %210 = vector.multi_reduction <add>, %209, %cst_58 [2] : vector<2x8x8xf32> to vector<2x8xf32>
    %211 = vector.shape_cast %210 : vector<2x8xf32> to vector<2x8x1xf32>
    %212 = tpu.reciprocal %211 {approx = true} : vector<2x8x1xf32> -> vector<2x8x1xf32>
    %213 = vector.broadcast %212 : vector<2x8x1xf32> to vector<2x8x8xf32>
    %214 = arith.mulf %209, %213 : vector<2x8x8xf32>
    %215 = arith.truncf %214 : vector<2x8x8xf32> to vector<2x8x8xbf16>
    "tpu.trace_start"() <{level = 10 : i32, message = "bij,bjd->bid"}> : () -> ()
    %cst_59 = arith.constant dense<0.000000e+00> : vector<2x8x32xf32>
    %216 = tpu.matmul %215, %201, %cst_59 {dimension_numbers = #tpu.dot_dimension_numbers<[2], [1], [1], [2], [0, 0, 0, 1, 1, 2], [0], [0]>} : vector<2x8x8xbf16>, vector<2x8x32xbf16>, vector<2x8x32xf32> -> vector<2x8x32xf32>
    "tpu.trace_stop"() : () -> ()
    %217 = vector.shape_cast %216 : vector<2x8x32xf32> to vector<16x32xf32>
    %218 = arith.truncf %217 : vector<16x32xf32> to vector<16x32xbf16>
    %219 = vector.extract_strided_slice %32 {offsets = [96, 0], sizes = [32, 32], strides = [1, 1]} : vector<128x32xbf16> to vector<32x32xbf16>
    %cst_60 = arith.constant dense<0.000000e+00> : vector<16x32xf32>
    %220 = tpu.matmul %218, %219, %cst_60 {dimension_numbers = #tpu.dot_dimension_numbers<[1], [0], [0], [1], [0, 0, 1, 1], [], []>} : vector<16x32xbf16>, vector<32x32xbf16>, vector<16x32xf32> -> vector<16x32xf32>
    %221 = arith.addf %174, %220 : vector<16x32xf32>
    %222 = arith.addf %3, %221 : vector<16x32xf32>
    %223 = arith.mulf %222, %222 : vector<16x32xf32>
    %cst_61 = arith.constant dense<0.000000e+00> : vector<16xf32>
    %224 = vector.multi_reduction <add>, %223, %cst_61 [1] : vector<16x32xf32> to vector<16xf32>
    %225 = vector.shape_cast %224 : vector<16xf32> to vector<16x1xf32>
    %cst_62 = arith.constant 1.000000e-24 : f32
    %226 = vector.broadcast %cst_62 : f32 to vector<16x1xf32>
    %227 = arith.maximumf %225, %226 : vector<16x1xf32>
    %228 = math.rsqrt %227 : vector<16x1xf32>
    %229 = vector.broadcast %228 : vector<16x1xf32> to vector<16x32xf32>
    %230 = arith.mulf %222, %229 : vector<16x32xf32>
    %cst_63 = arith.constant 5.65685415 : f32
    %231 = vector.broadcast %cst_63 : f32 to vector<16x32xf32>
    %232 = arith.mulf %230, %231 : vector<16x32xf32>
    %233 = arith.truncf %232 : vector<16x32xf32> to vector<16x32xbf16>
    %c0_64 = arith.constant 0 : index
    %c0_65 = arith.constant 0 : index
    %c0_66 = arith.constant 0 : index
    %234 = vector.load %arg7[%c0_64, %c0_65, %c0_66] : memref<1x32x128xbf16, #tpu.memory_space<vmem>>, vector<1x32x128xbf16>
    %235 = vector.shape_cast %234 : vector<1x32x128xbf16> to vector<32x128xbf16>
    %cst_67 = arith.constant dense<0.000000e+00> : vector<16x128xf32>
    %236 = tpu.matmul %233, %235, %cst_67 {dimension_numbers = #tpu.dot_dimension_numbers<[1], [0], [0], [1], [0, 0, 1, 1], [], []>} : vector<16x32xbf16>, vector<32x128xbf16>, vector<16x128xf32> -> vector<16x128xf32>
    %237 = arith.negf %236 : vector<16x128xf32>
    %238 = math.exp %237 : vector<16x128xf32>
    %cst_68 = arith.constant 1.000000e+00 : f32
    %239 = vector.broadcast %cst_68 : f32 to vector<16x128xf32>
    %240 = arith.addf %239, %238 : vector<16x128xf32>
    %241 = arith.divf %239, %240 : vector<16x128xf32>
    %242 = arith.mulf %236, %241 : vector<16x128xf32>
    %c0_69 = arith.constant 0 : index
    %c0_70 = arith.constant 0 : index
    %c0_71 = arith.constant 0 : index
    %243 = vector.load %arg9[%c0_69, %c0_70, %c0_71] : memref<1x2x256xf32, #tpu.memory_space<vmem>>, vector<1x2x256xf32>
    %244 = vector.shape_cast %243 : vector<1x2x256xf32> to vector<2x256xf32>
    %245 = vector.extract_strided_slice %244 {offsets = [0, 0], sizes = [2, 128], strides = [1, 1]} : vector<2x256xf32> to vector<2x128xf32>
    %246 = vector.extract_strided_slice %244 {offsets = [0, 128], sizes = [2, 128], strides = [1, 1]} : vector<2x256xf32> to vector<2x128xf32>
    %247 = vector.shape_cast %242 : vector<16x128xf32> to vector<2x8x128xf32>
    %248 = vector.shape_cast %245 : vector<2x128xf32> to vector<2x1x128xf32>
    %cst_72 = arith.constant 1.000000e+00 : f32
    %249 = vector.broadcast %cst_72 : f32 to vector<2x1x128xf32>
    %250 = arith.addf %248, %249 : vector<2x1x128xf32>
    %251 = vector.broadcast %250 : vector<2x1x128xf32> to vector<2x8x128xf32>
    %252 = arith.mulf %247, %251 : vector<2x8x128xf32>
    %253 = vector.shape_cast %246 : vector<2x128xf32> to vector<2x1x128xf32>
    %254 = vector.broadcast %253 : vector<2x1x128xf32> to vector<2x8x128xf32>
    %255 = arith.addf %252, %254 : vector<2x8x128xf32>
    %256 = vector.shape_cast %255 : vector<2x8x128xf32> to vector<16x128xf32>
    %257 = arith.truncf %256 : vector<16x128xf32> to vector<16x128xbf16>
    %c0_73 = arith.constant 0 : index
    %c0_74 = arith.constant 0 : index
    %c0_75 = arith.constant 0 : index
    %258 = vector.load %arg8[%c0_73, %c0_74, %c0_75] : memref<1x128x32xbf16, #tpu.memory_space<vmem>>, vector<1x128x32xbf16>
    %259 = vector.shape_cast %258 : vector<1x128x32xbf16> to vector<128x32xbf16>
    %cst_76 = arith.constant dense<0.000000e+00> : vector<16x32xf32>
    %260 = tpu.matmul %257, %259, %cst_76 {dimension_numbers = #tpu.dot_dimension_numbers<[1], [0], [0], [1], [0, 0, 1, 1], [], []>} : vector<16x128xbf16>, vector<128x32xbf16>, vector<16x32xf32> -> vector<16x32xf32>
    %261 = arith.addf %222, %260 : vector<16x32xf32>
    %c0_77 = arith.constant 0 : index
    %c0_78 = arith.constant 0 : index
    %262 = vector.load %arg11[%c0_77, %c0_78] : memref<16x32xf32, #tpu.memory_space<vmem>>, vector<16x32xf32>
    tpu.vector_store %arg11[%c0_77, %c0_78], %261 {strides = array<i32>} : memref<16x32xf32, #tpu.memory_space<vmem>>, vector<16x32xf32>,
    %c1_i32 = arith.constant 1 : i32
    %263 = arith.cmpi eq, %arg0, %c1_i32 : i32
    %264 = arith.extui %263 : i1 to i32
    %c0_i32_79 = arith.constant 0 : i32
    %265 = arith.cmpi ne, %264, %c0_i32_79 : i32
    scf.if %265 {
      %266 = vector.shape_cast %261 : vector<16x32xf32> to vector<2x8x32xf32>
      %c0_80 = arith.constant 0 : index
      %c0_81 = arith.constant 0 : index
      %c0_82 = arith.constant 0 : index
      %267 = vector.load %arg10[%c0_80, %c0_81, %c0_82] : memref<2x8x32xf32, #tpu.memory_space<vmem>>, vector<2x8x32xf32>
      tpu.vector_store %arg10[%c0_80, %c0_81, %c0_82], %266 {strides = array<i32>} : memref<2x8x32xf32, #tpu.memory_space<vmem>>, vector<2x8x32xf32>,
    } else {
    }
    return
  }
  func.func @transform_0(%arg0: i32) -> (i32, i32, i32) {
    %c0_i32 = arith.constant 0 : i32
    %c0_i32_0 = arith.constant 0 : i32
    %c0_i32_1 = arith.constant 0 : i32
    %c0_i32_2 = arith.constant 0 : i32
    return %c0_i32, %c0_i32_0, %c0_i32_1 : i32, i32, i32
  }
  func.func @transform_1(%arg0: i32) -> (i32, i32, i32) {
    %c0_i32 = arith.constant 0 : i32
    %c0_i32_0 = arith.constant 0 : i32
    %c0_i32_1 = arith.constant 0 : i32
    return %arg0, %c0_i32, %c0_i32_0 : i32, i32, i32
  }
  func.func @transform_2(%arg0: i32) -> (i32, i32, i32) {
    %c0_i32 = arith.constant 0 : i32
    %c0_i32_0 = arith.constant 0 : i32
    %c0_i32_1 = arith.constant 0 : i32
    return %arg0, %c0_i32, %c0_i32_0 : i32, i32, i32
  }
  func.func @transform_3(%arg0: i32) -> (i32, i32, i32) {
    %c0_i32 = arith.constant 0 : i32
    %c0_i32_0 = arith.constant 0 : i32
    %c0_i32_1 = arith.constant 0 : i32
    return %arg0, %c0_i32, %c0_i32_0 : i32, i32, i32
  }
  func.func @transform_4(%arg0: i32) -> (i32, i32, i32) {
    %c0_i32 = arith.constant 0 : i32
    %c0_i32_0 = arith.constant 0 : i32
    %c0_i32_1 = arith.constant 0 : i32
    return %arg0, %c0_i32, %c0_i32_0 : i32, i32, i32
  }
  func.func @transform_5(%arg0: i32) -> (i32, i32, i32) {
    %c0_i32 = arith.constant 0 : i32
    %c0_i32_0 = arith.constant 0 : i32
    %c0_i32_1 = arith.constant 0 : i32
    return %arg0, %c0_i32, %c0_i32_0 : i32, i32, i32
  }
  func.func @transform_6(%arg0: i32) -> (i32, i32, i32) {
    %c0_i32 = arith.constant 0 : i32
    %c0_i32_0 = arith.constant 0 : i32
    %c0_i32_1 = arith.constant 0 : i32
    return %arg0, %c0_i32, %c0_i32_0 : i32, i32, i32
  }
  func.func @transform_7(%arg0: i32) -> (i32, i32, i32) {
    %c0_i32 = arith.constant 0 : i32
    %c0_i32_0 = arith.constant 0 : i32
    %c0_i32_1 = arith.constant 0 : i32
    return %arg0, %c0_i32, %c0_i32_0 : i32, i32, i32
  }
  func.func @transform_8(%arg0: i32) -> (i32, i32, i32) {
    %c0_i32 = arith.constant 0 : i32
    %c0_i32_0 = arith.constant 0 : i32
    %c0_i32_1 = arith.constant 0 : i32
    return %arg0, %c0_i32, %c0_i32_0 : i32, i32, i32
  }
  func.func @transform_9(%arg0: i32) -> (i32, i32, i32) {
    %c0_i32 = arith.constant 0 : i32
    %c0_i32_0 = arith.constant 0 : i32
    %c0_i32_1 = arith.constant 0 : i32
    %c0_i32_2 = arith.constant 0 : i32
    return %c0_i32, %c0_i32_0, %c0_i32_1 : i32, i32, i32
  }
}

</mosaic_0001>

<bundles_post_ra>
// kernel: transformer_forward.1
= control target key start
LH: loop header
LB: loop body
LE: loop exit
PB: predicated region body
PF: predicated region fallthrough
CT: control target
= control target key end

     0   :  { %14 = vsyncpa [#allocation4], 0  ;;  %s2853_s30 = smov 0   ;;  %s3301_s0 = inlined_call_operand.vmem [shape: f32[2,8,32], index: 0, kind: input, shape index: {}]   ;;  %s3302_s1 = inlined_call_operand.vmem [shape: f32[2,1,32], index: 1, kind: input, shape index: {}]   ;;  %s3303_s2 = inlined_call_operand.vmem [shape: bf16[2,32,384], index: 2, kind: input, shape index: {}]   ;;  %s3304_s3 = inlined_call_operand.vmem [shape: f32[2,1,32], index: 3, kind: input, shape index: {}]   ;;  %s3305_s4 = inlined_call_operand.vmem [shape: f32[2,1,32], index: 4, kind: input, shape index: {}]   ;;  %s3306_s5 = inlined_call_operand.vmem [shape: bf16[2,128,32], index: 5, kind: input, shape index: {}]   ;;  %s3307_s6 = inlined_call_operand.vmem [shape: bf16[2,32,128], index: 6, kind: input, shape index: {}]   ;;  %s3308_s7 = inlined_call_operand.vmem [shape: bf16[2,128,32], index: 7, kind: input, shape index: {}]   ;;  %s3309_s8 = inlined_call_operand.vmem [shape: f32[2,2,256], index: 8, kind: input, shape index: {}]   ;;  %s3310_s9 = inlined_call_operand.hbm [shape: f32[2,8,32], index: 9, kind: output, shape index: {}]  }
   0x1 LB: > { %s2859_s10 = sadd.s32 4294967295, %s2792_s30   ;;  %p2329_p0 = scmp.ge.s32.totalorder %s2792_s30, 1  ;;  %s2792_s30 = sphi %s2853_s30, %s20_s30  }
   0x2   : > { %p347_p1 = scmp.lt.s32.totalorder %s2792_s30, 3 }
   0x4   : > { %p348_p2 = pnand %p2329_p0, %p347_p1 }
   0x5   : > { %p407_p3 = scmp.lt.s32.totalorder (!%p348_p2), %s2859_s10, 1  ;;  %p2339_p4 = scmp.ne.s32.totalorder (!%p348_p2), %s2859_s10, 0 }
   0x6   : > { %351 = sbr.rel (%p348_p2) target bundleno = 4349 (0x10fd), region = 56 }
   0xd   : > { %s2865_s11 = scalar_select %p407_p3, %s2859_s10, 1 }
   0xe   : > { %445 = sbr.rel (%p2339_p4) target bundleno = 21 (0x15), region = 60  ;;  %v446_v0 = vld [vmem:[%s3301_s0] sm:$0xff] (!%p2339_p4)  ;;  %vm448_vm0 = vcmask (!%p2339_p4), 261120   ;;  %v447_v1 = vld [vmem:[%s3301_s0 + $0x8] sm:$0xff] (!%p2339_p4) }
   0xf   : > { %s409_s14 = scalar_lea.vmem %s3302_s1, %s2865_s11  ;;  %s2624_s15 = smul.u32 48, %s2865_s11  ;;  %449 = vst.msk [vmem:[#allocation2] sm:$0xff] (!%p2339_p4), %vm448_vm0, %v446_v0  ;;  %450 = vst.msk [vmem:[#allocation2 + $0x8] sm:$0xff] (!%p2339_p4), %vm448_vm0, %v447_v1 }
  0x10   : > { %s420_s21 = scalar_lea.vmem %s3305_s4, %s2865_s11  ;;  %s2397_s25 = sshll.u32 %s2865_s11, 6 }
  0x11   : > { %s2883_s24 = scalar_lea.vmem %s3303_s2, %s2624_s15  ;;  %s2889_s28 = scalar_lea.vmem %s3306_s5, %s2397_s25 }
  0x12   : > { %s2398_s29 = sshll.u32 %s2865_s11, 4  ;;  %s2900_s20 = scalar_lea.vmem %s3308_s7, %s2397_s25 }
  0x13   : > { %s2895_s16 = scalar_lea.vmem %s3307_s6, %s2398_s29  ;;  %s2400_s22 = sshll.u32 %s2865_s11, 2 }
  0x14   : > { %s2906_s18 = scalar_lea.vmem %s3309_s8, %s2400_s22 }
  0x15 PF: > { %vm456_vm1 = vcmask 261120   ;;  %v2648_v8 = vld [vmem:[%s2883_s24 + $0x4] ss:$12 sps:$4 sm:$0xff]   ;;  %v2650_v9 = vld [vmem:[%s2883_s24] ss:$12 sps:$4 sm:$0xff]   ;;  %v2794_v11 = vmov 0   ;;  %v471_v17 = vlaneseq  ;;  %s3311_s15 = scalar_lea.vmem %s3304_s3, %s2865_s11 }
  0x16   : > { %v451_v2 = vld [vmem:[#allocation2] sm:$0xff]  ;;  %v452_v3 = vld [vmem:[#allocation2 + $0x8] sm:$0xff]  ;;  %522 = vmatprep.subr.bf16.mxu0 %v2648_v8  ;;  %554 = vmatprep.mubr.bf16.mxu0 %v2794_v11  ;;  %v2795_v13 = vmov 0.0   ;;  %vm2796_vm2 = vmmov 0   ;;  %vm796_vm3 = vcmask 1043456   ;;  %vm768_vm4 = vcmask 64512  }
  0x17   : > { %v454_v4 = vmul.f32 %v451_v2, %v451_v2  ;;  %v455_v5 = vmul.f32 %v452_v3, %v452_v3  ;;  %v2651_v10 = vld [vmem:[%s2883_s24 + $0x1c] ss:$12 sps:$4 sm:$0xff]   ;;  %523 = vmatpush1.bf16.msra.mxu0 %v2650_v9  ;;  %v2653_v12 = vld [vmem:[%s2883_s24 + $0x18] ss:$12 sps:$4 sm:$0xff]   ;;  %2474 = vmatprep.subr.bf16.mxu1 %v2795_v13  ;;  %v472_v19 = vshrl.u32 %v471_v17, 7  ;;  %s2798_s11 = smov 32  }
  0x18   : > { %524 = vmatprep.subr.bf16.mxu0 %v2651_v10  ;;  %2476 = vmatprep.mubr.msk.bf16.mxu1 %vm2796_vm2, %v2795_v13  ;;  %v453_v20 = vld [vmem:[%s409_s14] sm:$0x1]  ;;  %v2654_v30 = vld [vmem:[%s2883_s24 + $0x8] ss:$12 sps:$4 sm:$0xff]   ;;  %s2797_s14 = smov 96   ;;  %p2392_p5 = scmp.ne.s32.totalorder %s2859_s10, 1 }
  0x19   : > { %v457_v6 = vsel %vm456_vm1, %v454_v4, 0.0  ;;  %v460_v7 = vsel %vm456_vm1, %v455_v5, 0.0  ;;  %v469_v21 = vmul.f32 5.656854, %v453_v20  ;;  %v2930_v22 = vsub.s32 0, %v472_v19 }
  0x1a   : > { %458 = vadd.xlane.f32.xlu0 %v457_v6  ;;  %v2655_v32 = vld [vmem:[%s2883_s24 + $0x20] ss:$12 sps:$4 sm:$0xff]  }
  0x1b   : > { %525 = vmatpush1.bf16.msra.mxu0 %v2653_v12  ;;  %v474_v25 = vrot.slane %v469_v21, %v2930_v22  ;;  %v2988_v58 = vld [vmem:[%s420_s21] ss:$0 sm:$0xff]  ;;  %s2799_s21 = smov 64  }
  0x1c   : > { %2460 = vmatprep.subr.bf16.mxu0 %v2795_v13 }
  0x1e   : > { %461 = vadd.xlane.f32.xlu0 %v460_v7 }
  0xa7   : > { %v459_v14 = vpop.xlane.xlu0 %458 }
  0xa8   : > { %v463_v15 = vmax.f32 %v459_v14, 1e-24 }
  0xaa   : > { %2674 = vrsqrt.f32 %v463_v15 }
  0xab   : > { %v462_v16 = vpop.xlane.xlu0 %461 }
  0xac   : > { %v464_v18 = vmax.f32 %v462_v16, 1e-24 }
  0xae   : > { %2676 = vrsqrt.f32 %v464_v18 }
  0xb4   : > { %v2675_v23 = vpop.eup %2674 }
  0xb5   : > { %v467_v24 = vmul.f32 %v2675_v23, %v451_v2  ;;  %v2999_v2 = vld [vmem:[%s3311_s15] ss:$0 sm:$0xff] }
  0xb7   : > { %v476_v28 = vmul.f32 %v474_v25, %v467_v24 }
  0xb8   : > { %v2677_v26 = vpop.eup %2676 }
  0xb9   : > { %v468_v27 = vmul.f32 %v2677_v26, %v452_v3 }
  0xbb   : > { %v477_v29 = vmul.f32 %v474_v25, %v468_v27 }
  0xbd   : > { %v478_v31 = vpack.c.bf16 %v477_v29, %v476_v28 }
  0xbf   : > { %2346 = vmatmul.mubr.msk.bf16.vlgmr.msra.gmra.mrb[0].mxu0 %vm456_vm1, %v478_v31 }
  0xc0   : > { %2461 = vmatpush3.bf16.msra.mxu0 %v2654_v30  ;;  %2464 = vmatprep.mubr.msk.bf16.mxu0 %vm2796_vm2, %v2795_v13 }
  0xc1   : > { %2462 = vmatprep.subr.bf16.mxu0 %v2795_v13 }
  0xc4   : > { %2463 = vmatpush3.bf16.msra.mxu0 %v2655_v32 }
  0xc5   : > { %2468 = vmatprep.subr.bf16.mxu0 %v2795_v13 }
  0xc7   : > { %2465 = vmatmul.mubr.msk.bf16.vlgmr.msra.gmra.mrb[4].mxu0 %vm456_vm1, %v478_v31 }
  0xc8   : > { %2470 = vmatprep.mubr.msk.bf16.mxu0 %vm2796_vm2, %v2795_v13 }
 0x192   : > { %v2943_v33 = vpop.f32.mrb[0].mxu0 }
 0x193   : > { %v2945_v34 = vpop.f32.mrb[1].mxu0  ;;  %v2949_v35 = vmul.f32 %v2943_v33, %v2943_v33 }
 0x194   : > { %v2951_v36 = vpop.f32.mrb[2].mxu0  ;;  %v2955_v37 = vmul.f32 %v2945_v34, %v2945_v34 }
 0x195   : > { %v2957_v38 = vpop.f32.mrb[3].mxu0  ;;  %v638_v39 = vsel %vm456_vm1, %v2949_v35, 0.0  ;;  %v2971_v44 = vmul.f32 %v2951_v36, %v2951_v36 }
 0x196   : > { %639 = vadd.xlane.f32.xlu0 %v638_v39  ;;  %v654_v40 = vsel %vm456_vm1, %v2955_v37, 0.0  ;;  %v2965_v41 = vmul.f32 %v2957_v38, %v2957_v38 }
 0x197   : > { %655 = vadd.xlane.f32.xlu1 %v654_v40  ;;  %v641_v48 = vsel %vm456_vm1, %v2971_v44, 0.0 }
 0x198   : > { %v657_v43 = vsel %vm456_vm1, %v2965_v41, 0.0 }
 0x19a   : > { %v599_v42 = vpop.f32.mrb[4].mxu0 }
 0x19b   : > { %658 = vadd.xlane.f32.xlu1 %v657_v43  ;;  %v2466_v45 = vpop.f32.mrb[5].mxu0  ;;  %v3006_v9 = vpack.c.bf16 %v599_v42, %v599_v42 }
 0x19c   : > { %v602_v46 = vpop.f32.mrb[6].mxu0 }
 0x19d   : > { %v2467_v47 = vpop.f32.mrb[7].mxu0  ;;  %v3011_v14 = vpack.c.bf16 %v602_v46, %v602_v46  ;;  %v798_v15 = vsel %vm796_vm3, %v3006_v9, 0 }
 0x19f   : > { %642 = vadd.xlane.f32.xlu1 %v641_v48  ;;  %v844_v17 = vsel %vm796_vm3, %v3011_v14, 0 }
 0x1ac   : > { %914 = vrot.lane.b32.xlu0 %v2955_v37, %s2797_s14 }
 0x1b0   : > { %916 = vrot.lane.b32.xlu1 %v2965_v41, %s2797_s14 }
 0x1b4   : > { %889 = vrot.lane.b32.xlu1 %v2949_v35, %s2797_s14 }
 0x1b8   : > { %891 = vrot.lane.b32.xlu1 %v2971_v44, %s2797_s14 }
 0x223   : > { %v640_v49 = vpop.xlane.xlu0 %639 }
 0x224   : > { %v656_v50 = vpop.xlane.xlu1 %655  ;;  %v644_v51 = vmax.f32 %v640_v49, 1e-24 }
 0x225   : > { %v660_v52 = vmax.f32 %v656_v50, 1e-24 }
 0x227   : > { %2678 = vrsqrt.f32 %v660_v52  ;;  %v915_v27 = vpop.permute.xlu0 %914 }
 0x228   : > { %v659_v53 = vpop.xlane.xlu1 %658  ;;  %2680 = vrsqrt.f32 %v644_v51  ;;  %v920_v40 = vsel %vm456_vm1, %v915_v27, 0.0 }
 0x229   : > { %v661_v54 = vmax.f32 %v659_v53, 1e-24 }
 0x22b   : > { %2682 = vrsqrt.f32 %v661_v54 }
 0x22c   : > { %v643_v55 = vpop.xlane.xlu1 %642 }
 0x22d   : > { %v645_v56 = vmax.f32 %v643_v55, 1e-24 }
 0x22f   : > { %2684 = vrsqrt.f32 %v645_v56 }
 0x230   : > { %v917_v18 = vpop.permute.xlu1 %916 }
 0x231   : > { %v2679_v57 = vpop.eup %2678  ;;  %v923_v45 = vsel %vm456_vm1, %v917_v18, 0.0 }
 0x232   : > { %v664_v59 = vmul.f32 %v2679_v57, %v2945_v34  ;;  %v2681_v60 = vpop.eup %2680 }
 0x233   : > { %v648_v63 = vmul.f32 %v2681_v60, %v2943_v33 }
 0x234   : > { %v666_v61 = vmul.f32 %v2988_v58, %v664_v59  ;;  %v890_v23 = vpop.permute.xlu1 %889 }
 0x235   : > { %v2683_v62 = vpop.eup %2682  ;;  %v650_v7 = vmul.f32 %v2999_v2, %v648_v63  ;;  %v895_v46 = vsel %vm456_vm1, %v890_v23, 0.0 }
 0x236   : > { %v670_v0 = vpack.c.bf16 %v666_v61, %v666_v61  ;;  %v665_v1 = vmul.f32 %v2683_v62, %v2957_v38 }
 0x237   : > { %v668_v11 = vpack.c.bf16 %v650_v7, %v650_v7 }
 0x238   : > { %v678_v3 = vsel %vm456_vm1, %v670_v0, 0  ;;  %v667_v4 = vmul.f32 %v2988_v58, %v665_v1  ;;  %v892_v42 = vpop.permute.xlu1 %891 }
 0x239   : > { %v2685_v5 = vpop.eup %2684  ;;  %2469 = vmatpush3.bf16.xpose.msra.mxu0 %v678_v3  ;;  %v898_v43 = vsel %vm456_vm1, %v892_v42, 0.0 }
 0x23a   : > { %v671_v6 = vpack.c.bf16 %v667_v4, %v667_v4  ;;  %2480 = vmatprep.subr.bf16.mxu0 %v2795_v13  ;;  %v649_v8 = vmul.f32 %v2685_v5, %v2951_v36 }
 0x23c   : > { %v724_v10 = vsel %vm456_vm1, %v671_v6, 0  ;;  %v651_v12 = vmul.f32 %v2999_v2, %v649_v8 }
 0x23d   : > { %2475 = vmatpush3.bf16.xpose.msra.mxu1 %v724_v10 }
 0x23e   : > { %2486 = vmatprep.subr.bf16.mxu1 %v2795_v13  ;;  %v669_v16 = vpack.c.bf16 %v651_v12, %v651_v12 }
 0x240   : > { %2471 = vmatmul.mubr.msk.bf16.vlgmr.msra.gmra.mrb[8].mxu0 %vm456_vm1, %v668_v11 }
 0x241   : > { %2481 = vmatpush3.bf16.msra.mxu0 %v798_v15  ;;  %2482 = vmatprep.mubr.msk.bf16.mxu0 %vm2796_vm2, %v2795_v13 }
 0x242   : > { %2492 = vmatprep.subr.bf16.mxu0 %v2795_v13 }
 0x244   : > { %2477 = vmatmul.mubr.msk.bf16.vlgmr.msra.gmra.mrb[0].mxu1 %vm456_vm1, %v669_v16 }
 0x245   : > { %2487 = vmatpush3.bf16.msra.mxu1 %v844_v17  ;;  %2488 = vmatprep.mubr.msk.bf16.mxu1 %vm2796_vm2, %v2795_v13 }
 0x246   : > { %2498 = vmatprep.subr.bf16.mxu1 %v2795_v13 }
 0x313   : > { %v714_v19 = vpop.f32.mrb[8].mxu0 }
 0x314   : > { %v766_v20 = vmul.f32 8.0, %v714_v19  ;;  %v2472_v21 = vpop.f32.mrb[9].mxu0 }
 0x315   : > { %v717_v24 = vpop.f32.mrb[10].mxu0 }
 0x316   : > { %v2473_v25 = vpop.f32.mrb[11].mxu0  ;;  %v769_v26 = vsel %vm768_vm4, %v766_v20, -inf }
 0x317   : > { %v760_v28 = vpop.f32.mrb[0].mxu1  ;;  %770 = vmax.xlane.f32.xlu0 %v769_v26 }
 0x318   : > { %v767_v29 = vmul.f32 8.0, %v760_v28  ;;  %v2478_v30 = vpop.f32.mrb[1].mxu1 }
 0x319   : > { %v763_v31 = vpop.f32.mrb[2].mxu1 }
 0x31a   : > { %v2479_v32 = vpop.f32.mrb[3].mxu1  ;;  %v772_v39 = vsel %vm768_vm4, %v767_v29, -inf }
 0x31b   : > { %773 = vmax.xlane.f32.xlu1 %v772_v39  ;;  %921 = vadd.xlane.f32.xlu0 %v920_v40 }
 0x31f   : > { %899 = vadd.xlane.f32.xlu1 %v898_v43  ;;  %924 = vadd.xlane.f32.xlu0 %v923_v45 }
 0x323   : > { %896 = vadd.xlane.f32.xlu0 %v895_v46 }
 0x330   : > { %907 = vrot.lane.b32.xlu1 %v2999_v2, %s2798_s11 }
 0x339   : > { %932 = vrot.lane.b32.xlu0 %v2988_v58, %s2798_s11 }
 0x3a4   : > { %v771_v47 = vpop.xlane.xlu0 %770 }
 0x3a5   : > { %v775_v48 = vsub.f32 %v766_v20, %v771_v47 }
 0x3a7   : > { %v777_v49 = vmul.f32 1.442695, %v775_v48 }
 0x3a8   : > { %v774_v50 = vpop.xlane.xlu1 %773  ;;  %v922_v51 = vpop.xlane.xlu0 %921 }
 0x3a9   : > { %2686 = vpow2.f32 %v777_v49  ;;  %v776_v52 = vsub.f32 %v767_v29, %v774_v50  ;;  %v926_v62 = vmax.f32 %v922_v51, 1e-24 }
 0x3ab   : > { %v779_v53 = vmul.f32 1.442695, %v776_v52 }
 0x3ac   : > { %v925_v54 = vpop.xlane.xlu0 %924  ;;  %v900_v56 = vpop.xlane.xlu1 %899 }
 0x3ad   : > { %2688 = vpow2.f32 %v779_v53  ;;  %v927_v55 = vmax.f32 %v925_v54, 1e-24  ;;  %v902_v61 = vmax.f32 %v900_v56, 1e-24 }
 0x3af   : > { %2690 = vrsqrt.f32 %v927_v55 }
 0x3b0   : > { %v897_v57 = vpop.xlane.xlu0 %896  ;;  %v908_v12 = vpop.permute.xlu1 %907 }
 0x3b1   : > { %v901_v59 = vmax.f32 %v897_v57, 1e-24 }
 0x3b3   : > { %v2687_v60 = vpop.eup %2686  ;;  %2692 = vrsqrt.f32 %v901_v59 }
 0x3b4   : > { %v781_v63 = vsel %vm768_vm4, %v2687_v60, 0.0  ;;  %2694 = vrsqrt.f32 %v902_v61  ;;  %v933_v6 = vpop.permute.xlu0 %932 }
 0x3b5   : > { %782 = vadd.xlane.f32.xlu1 %v781_v63  ;;  %2696 = vrsqrt.f32 %v926_v62 }
 0x3b7   : > { %v2689_v0 = vpop.eup %2688 }
 0x3b8   : > { %v784_v1 = vsel %vm768_vm4, %v2689_v0, 0.0 }
 0x3b9   : > { %785 = vadd.xlane.f32.xlu0 %v784_v1  ;;  %v2691_v3 = vpop.eup %2690 }
 0x3ba   : > { %v931_v4 = vmul.f32 %v2691_v3, %v2957_v38 }
 0x3bc   : > { %v936_v7 = vmul.f32 %v933_v6, %v931_v4 }
 0x3bd   : > { %v2693_v5 = vpop.eup %2692 }
 0x3be   : > { %v905_v8 = vmul.f32 %v2693_v5, %v2943_v33  ;;  %v2695_v10 = vpop.eup %2694  ;;  %v940_v15 = vpack.c.bf16 %v936_v7, %v936_v7 }
 0x3bf   : > { %v2697_v11 = vpop.eup %2696  ;;  %v906_v16 = vmul.f32 %v2695_v10, %v2951_v36 }
 0x3c0   : > { %v910_v17 = vmul.f32 %v908_v12, %v905_v8  ;;  %v930_v18 = vmul.f32 %v2697_v11, %v2945_v34 }
 0x3c1   : > { %v911_v19 = vmul.f32 %v908_v12, %v906_v16 }
 0x3c2   : > { %v937_v20 = vpack.c.bf16 %v910_v17, %v910_v17  ;;  %v935_v21 = vmul.f32 %v933_v6, %v930_v18 }
 0x3c3   : > { %v938_v23 = vpack.c.bf16 %v911_v19, %v911_v19 }
 0x3c4   : > { %v939_v24 = vpack.c.bf16 %v935_v21, %v935_v21 }
 0x3c6   : > { %997 = vrot.lane.b32.xlu1 %v940_v15, %s2797_s14 }
 0x3ca   : > { %942 = vrot.lane.b32.xlu1 %v937_v20, %s2797_s14 }
 0x3ce   : > { %994 = vrot.lane.b32.xlu1 %v938_v23, %s2797_s14 }
 0x3cf   : > { %945 = vrot.lane.b32.xlu0 %v939_v24, %s2797_s14 }
 0x442   : > { %v783_v25 = vpop.xlane.xlu1 %782 }
 0x443   : > { %2698 = vrcp.f32 %v783_v25 }
 0x446   : > { %v786_v26 = vpop.xlane.xlu0 %785  ;;  %v998_v32 = vpop.permute.xlu1 %997 }
 0x447   : > { %2700 = vrcp.f32 %v786_v26  ;;  %v1003_v43 = vsel %vm456_vm1, %v998_v32, 0 }
 0x44a   : > { %v946_v29 = vpop.permute.xlu0 %945  ;;  %v943_v45 = vpop.permute.xlu1 %942 }
 0x44b   : > { %v951_v40 = vsel %vm456_vm1, %v946_v29, 0 }
 0x44d   : > { %v2699_v27 = vpop.eup %2698 }
 0x44e   : > { %v789_v28 = vmul.f32 %v2699_v27, %v2687_v60  ;;  %v995_v46 = vpop.permute.xlu1 %994 }
 0x450   : > { %v791_v30 = vpack.c.bf16 %v789_v28, %v789_v28 }
 0x451   : > { %v2701_v31 = vpop.eup %2700 }
 0x452   : > { %v790_v39 = vmul.f32 %v2701_v31, %v2689_v0  ;;  %2483 = vmatmul.mubr.msk.bf16.vlgmr.msra.gmra.mrb[12].mxu0 %vm768_vm4, %v791_v30 }
 0x453   : > { %2493 = vmatpush3.bf16.xpose.msra.mxu0 %v951_v40  ;;  %2494 = vmatprep.mubr.msk.bf16.mxu0 %vm2796_vm2, %v2795_v13 }
 0x454   : > { %v792_v42 = vpack.c.bf16 %v790_v39, %v790_v39  ;;  %2504 = vmatprep.subr.bf16.mxu0 %v2795_v13 }
 0x456   : > { %2489 = vmatmul.mubr.msk.bf16.vlgmr.msra.gmra.mrb[4].mxu1 %vm768_vm4, %v792_v42 }
 0x457   : > { %2499 = vmatpush3.bf16.xpose.msra.mxu1 %v1003_v43  ;;  %2500 = vmatprep.mubr.msk.bf16.mxu1 %vm2796_vm2, %v2795_v13 }
 0x458   : > { %2510 = vmatprep.subr.bf16.mxu1 %v2795_v13 }
 0x45a   : > { %2495 = vmatmul.mubr.msk.bf16.vlgmr.msra.gmra.mrb[16].mxu0 %vm456_vm1, %v943_v45 }
 0x45b   : > { %2506 = vmatprep.mubr.msk.bf16.mxu0 %vm2796_vm2, %v2795_v13 }
 0x45e   : > { %2501 = vmatmul.mubr.msk.bf16.vlgmr.msra.gmra.mrb[8].mxu1 %vm456_vm1, %v995_v46 }
 0x45f   : > { %2512 = vmatprep.mubr.msk.bf16.mxu1 %vm2796_vm2, %v2795_v13 }
 0x525   : > { %v3061_v47 = vpop.f32.mrb[12].mxu0 }
 0x526   : > { %v2484_v48 = vpop.f32.mrb[13].mxu0 }
 0x527   : > { %v837_v49 = vpop.f32.mrb[14].mxu0  ;;  %v2656_v48 = vld [vmem:[%s2889_s28] sm:$0xff]  }
 0x528   : > { %v2485_v50 = vpop.f32.mrb[15].mxu0 }
 0x529   : > { %v3063_v51 = vpop.f32.mrb[4].mxu1  ;;  %v2657_v50 = vld [vmem:[%s2889_s28 + $0x8] sm:$0xff]  }
 0x52a   : > { %v886_v52 = vpack.c.bf16 %v3063_v51, %v3061_v47  ;;  %v2490_v53 = vpop.f32.mrb[5].mxu1 }
 0x52b   : > { %v883_v54 = vpop.f32.mrb[6].mxu1  ;;  %v2658_v53 = vld [vmem:[%s2889_s28 + $0x10] sm:$0xff]  }
 0x52c   : > { %v2491_v55 = vpop.f32.mrb[7].mxu1  ;;  %v2659_v54 = vld [vmem:[%s2889_s28 + $0x18] sm:$0xff]  }
 0x52d   : > { %v987_v56 = vpop.f32.mrb[16].mxu0 }
 0x52e   : > { %v1045_v57 = vmul.f32 8.0, %v987_v56  ;;  %v2496_v59 = vpop.f32.mrb[17].mxu0 }
 0x52f   : > { %v990_v60 = vpop.f32.mrb[18].mxu0 }
 0x530   : > { %v2497_v61 = vpop.f32.mrb[19].mxu0  ;;  %v1047_v62 = vsel %vm768_vm4, %v1045_v57, -inf }
 0x531   : > { %v1039_v63 = vpop.f32.mrb[8].mxu1  ;;  %1048 = vmax.xlane.f32.xlu0 %v1047_v62 }
 0x532   : > { %v1046_v0 = vmul.f32 8.0, %v1039_v63  ;;  %v2502_v1 = vpop.f32.mrb[9].mxu1 }
 0x533   : > { %v1042_v3 = vpop.f32.mrb[10].mxu1 }
 0x534   : > { %v2503_v4 = vpop.f32.mrb[11].mxu1  ;;  %v1050_v5 = vsel %vm768_vm4, %v1046_v0, -inf }
 0x535   : > { %1051 = vmax.xlane.f32.xlu1 %v1050_v5 }
 0x546   : > { %1121 = vrot.lane.b32.xlu1 %v3011_v14, %s2797_s14 }
 0x54a   : > { %1305 = vrot.lane.b32.xlu1 %v2955_v37, %s2799_s21 }
 0x54e   : > { %1307 = vrot.lane.b32.xlu1 %v2965_v41, %s2799_s21 }
 0x552   : > { %1284 = vrot.lane.b32.xlu1 %v2971_v44, %s2799_s21 }
 0x5be   : > { %v1049_v6 = vpop.xlane.xlu0 %1048 }
 0x5bf   : > { %v1053_v7 = vsub.f32 %v1045_v57, %v1049_v6 }
 0x5c1   : > { %v1055_v8 = vmul.f32 1.442695, %v1053_v7 }
 0x5c2   : > { %v1052_v10 = vpop.xlane.xlu1 %1051 }
 0x5c3   : > { %2702 = vpow2.f32 %v1055_v8  ;;  %v1054_v11 = vsub.f32 %v1046_v0, %v1052_v10 }
 0x5c5   : > { %v1057_v12 = vmul.f32 1.442695, %v1054_v11 }
 0x5c6   : > { %v1122_v15 = vpop.permute.xlu1 %1121 }
 0x5c7   : > { %2704 = vpow2.f32 %v1057_v12  ;;  %v1127_v16 = vsel %vm796_vm3, %v1122_v15, 0 }
 0x5c8   : > { %2511 = vmatpush3.bf16.msra.mxu1 %v1127_v16 }
 0x5c9   : > { %2524 = vmatprep.subr.bf16.mxu1 %v2795_v13 }
 0x5ca   : > { %v1306_v17 = vpop.permute.xlu1 %1305 }
 0x5cb   : > { %v1311_v25 = vsel %vm456_vm1, %v1306_v17, 0.0 }
 0x5cd   : > { %v2703_v18 = vpop.eup %2702 }
 0x5ce   : > { %v1308_v19 = vpop.permute.xlu1 %1307  ;;  %v1059_v20 = vsel %vm768_vm4, %v2703_v18, 0.0 }
 0x5cf   : > { %1060 = vadd.xlane.f32.xlu0 %v1059_v20  ;;  %v1314_v21 = vsel %vm456_vm1, %v1308_v19, 0.0 }
 0x5d0   : > { %1315 = vadd.xlane.f32.xlu1 %v1314_v21 }
 0x5d1   : > { %v2705_v23 = vpop.eup %2704 }
 0x5d2   : > { %v1062_v24 = vsel %vm768_vm4, %v2705_v23, 0.0  ;;  %v1285_v40 = vpop.permute.xlu1 %1284 }
 0x5d3   : > { %1063 = vadd.xlane.f32.xlu0 %v1062_v24  ;;  %v1291_v46 = vsel %vm456_vm1, %v1285_v40, 0.0 }
 0x5e1   : > { %1300 = vrot.lane.b32.xlu1 %v2999_v2, %s2799_s21 }
 0x5e9   : > { %1072 = vrot.lane.b32.xlu0 %v3006_v9, %s2797_s14 }
 0x5ed   : > { %1282 = vrot.lane.b32.xlu0 %v2949_v35, %s2799_s21 }
 0x60c   : > { %1312 = vadd.xlane.f32.xlu0 %v1311_v25 }
 0x65c   : > { %v1061_v26 = vpop.xlane.xlu0 %1060 }
 0x65d   : > { %2706 = vrcp.f32 %v1061_v26  ;;  %v1316_v56 = vpop.xlane.xlu1 %1315 }
 0x65e   : > { %v1318_v47 = vmax.f32 %v1316_v56, 1e-24 }
 0x660   : > { %v1064_v27 = vpop.xlane.xlu0 %1063 }
 0x661   : > { %2708 = vrcp.f32 %v1064_v27  ;;  %v1301_v7 = vpop.permute.xlu1 %1300 }
 0x664   : > { %v1073_v28 = vpop.permute.xlu0 %1072 }
 0x665   : > { %v1078_v29 = vsel %vm796_vm3, %v1073_v28, 0 }
 0x666   : > { %2505 = vmatpush3.bf16.msra.mxu0 %v1078_v29 }
 0x667   : > { %v2707_v30 = vpop.eup %2706  ;;  %2516 = vmatprep.subr.bf16.mxu0 %v2795_v13 }
 0x668   : > { %v1067_v31 = vmul.f32 %v2707_v30, %v2703_v18  ;;  %v1283_v32 = vpop.permute.xlu0 %1282 }
 0x669   : > { %v1288_v39 = vsel %vm456_vm1, %v1283_v32, 0.0 }
 0x66a   : > { %1289 = vadd.xlane.f32.xlu0 %v1288_v39  ;;  %v1069_v42 = vpack.c.bf16 %v1067_v31, %v1067_v31 }
 0x66b   : > { %v2709_v43 = vpop.eup %2708 }
 0x66c   : > { %v1068_v45 = vmul.f32 %v2709_v43, %v2705_v23  ;;  %2507 = vmatmul.mubr.msk.bf16.vlgmr.msra.gmra.mrb[20].mxu0 %vm768_vm4, %v1069_v42 }
 0x66d   : > { %2520 = vmatprep.mubr.msk.bf16.mxu0 %vm2796_vm2, %v2795_v13  ;;  %2517 = vmatpush3.bf16.msra.mxu0 %v2658_v53 }
 0x66e   : > { %1292 = vadd.xlane.f32.xlu0 %v1291_v46  ;;  %v1070_v49 = vpack.c.bf16 %v1068_v45, %v1068_v45  ;;  %2518 = vmatprep.subr.bf16.mxu0 %v2795_v13 }
 0x670   : > { %2513 = vmatmul.mubr.msk.bf16.vlgmr.msra.gmra.mrb[12].mxu1 %vm768_vm4, %v1070_v49 }
 0x671   : > { %2525 = vmatpush3.bf16.msra.mxu1 %v2656_v48  ;;  %2528 = vmatprep.mubr.msk.bf16.mxu1 %vm2796_vm2, %v2795_v13 }
 0x672   : > { %2526 = vmatprep.subr.bf16.mxu1 %v2795_v13  ;;  %2519 = vmatpush3.bf16.msra.mxu0 %v2659_v54 }
 0x673   : > { %2532 = vmatprep.subr.bf16.mxu0 %v2795_v13 }
 0x675   : > { %2527 = vmatpush3.bf16.msra.mxu1 %v2657_v50 }
 0x676   : > { %2538 = vmatprep.subr.bf16.mxu1 %v2795_v13 }
 0x678   : > { %2529 = vmatmul.mubr.msk.bf16.vlgmr.msra.gmra.mrb[16].mxu1 %vm456_vm1, %v886_v52 }
 0x679   : > { %2540 = vmatprep.mubr.msk.bf16.mxu1 %vm2796_vm2, %v2795_v13 }
 0x684   : > { %1323 = vrot.lane.b32.xlu0 %v2988_v58, %s2799_s21 }
 0x699   : > { %v1313_v55 = vpop.xlane.xlu0 %1312 }
 0x69a   : > { %v1317_v57 = vmax.f32 %v1313_v55, 1e-24 }
 0x69c   : > { %2710 = vrsqrt.f32 %v1317_v57 }
 0x69d   : > { %2712 = vrsqrt.f32 %v1318_v47 }
 0x6a6   : > { %v2711_v59 = vpop.eup %2710 }
 0x6a7   : > { %v2713_v62 = vpop.eup %2712  ;;  %v1321_v63 = vmul.f32 %v2711_v59, %v2945_v34 }
 0x6a8   : > { %v1322_v1 = vmul.f32 %v2713_v62, %v2957_v38 }
 0x6f7   : > { %v1290_v51 = vpop.xlane.xlu0 %1289 }
 0x6f8   : > { %v1294_v52 = vmax.f32 %v1290_v51, 1e-24 }
 0x6fa   : > { %2714 = vrsqrt.f32 %v1294_v52 }
 0x6fb   : > { %v1293_v60 = vpop.xlane.xlu0 %1292 }
 0x6fc   : > { %v1295_v61 = vmax.f32 %v1293_v60, 1e-24 }
 0x6fe   : > { %2716 = vrsqrt.f32 %v1295_v61 }
 0x6ff   : > { %v1324_v0 = vpop.permute.xlu0 %1323 }
 0x700   : > { %v1326_v3 = vmul.f32 %v1324_v0, %v1321_v63  ;;  %v1327_v4 = vmul.f32 %v1324_v0, %v1322_v1 }
 0x702   : > { %v1330_v5 = vpack.c.bf16 %v1326_v3, %v1326_v3  ;;  %v1331_v10 = vpack.c.bf16 %v1327_v4, %v1327_v4 }
 0x704   : > { %v2715_v6 = vpop.eup %2714  ;;  %1336 = vrot.lane.b32.xlu1 %v1330_v5, %s2799_s21 }
 0x705   : > { %v1298_v8 = vmul.f32 %v2715_v6, %v2943_v33 }
 0x707   : > { %v1303_v11 = vmul.f32 %v1301_v7, %v1298_v8 }
 0x708   : > { %v2717_v12 = vpop.eup %2716  ;;  %1388 = vrot.lane.b32.xlu1 %v1331_v10, %s2799_s21 }
 0x709   : > { %v1299_v15 = vmul.f32 %v2717_v12, %v2951_v36  ;;  %v1328_v16 = vpack.c.bf16 %v1303_v11, %v1303_v11 }
 0x70b   : > { %v1304_v17 = vmul.f32 %v1301_v7, %v1299_v15  ;;  %1333 = vrot.lane.b32.xlu0 %v1328_v16, %s2799_s21 }
 0x70d   : > { %v1329_v18 = vpack.c.bf16 %v1304_v17, %v1304_v17 }
 0x70f   : > { %1385 = vrot.lane.b32.xlu1 %v1329_v18, %s2799_s21 }
 0x73f   : > { %v1114_v19 = vpop.f32.mrb[20].mxu0 }
 0x740   : > { %v2508_v20 = vpop.f32.mrb[21].mxu0 }
 0x741   : > { %v1117_v21 = vpop.f32.mrb[22].mxu0 }
 0x742   : > { %v2509_v23 = vpop.f32.mrb[23].mxu0 }
 0x743   : > { %v1163_v24 = vpop.f32.mrb[12].mxu1 }
 0x744   : > { %v1169_v25 = vpack.c.bf16 %v1163_v24, %v1114_v19  ;;  %v2514_v26 = vpop.f32.mrb[13].mxu1 }
 0x745   : > { %v1166_v27 = vpop.f32.mrb[14].mxu1 }
 0x746   : > { %v2515_v28 = vpop.f32.mrb[15].mxu1  ;;  %2521 = vmatmul.mubr.msk.bf16.vlgmr.msra.gmra.mrb[24].mxu0 %vm456_vm1, %v1169_v25 }
 0x747   : > { %2534 = vmatprep.mubr.msk.bf16.mxu0 %vm2796_vm2, %v2795_v13 }
 0x74b   : > { %v1275_v29 = vpop.f32.mrb[16].mxu1 }
 0x74c   : > { %v2530_v30 = vpop.f32.mrb[17].mxu1 }
 0x74d   : > { %v1278_v31 = vpop.f32.mrb[18].mxu1 }
 0x74e   : > { %v2531_v32 = vpop.f32.mrb[19].mxu1 }
 0x74f   : > { %v2660_v32 = vld [vmem:[%s2889_s28 + $0x20] sm:$0xff]  }
 0x776   : > { %v1337_v39 = vpop.permute.xlu1 %1336 }
 0x777   : > { %v1342_v40 = vsel %vm456_vm1, %v1337_v39, 0  ;;  %v2661_v39 = vld [vmem:[%s2889_s28 + $0x28] sm:$0xff]  }
 0x778   : > { %2533 = vmatpush3.bf16.xpose.msra.mxu0 %v1342_v40 }
 0x779   : > { %2544 = vmatprep.subr.bf16.mxu0 %v2795_v13 }
 0x77a   : > { %v1389_v42 = vpop.permute.xlu1 %1388 }
 0x77b   : > { %v1394_v43 = vsel %vm456_vm1, %v1389_v42, 0 }
 0x77c   : > { %2539 = vmatpush3.bf16.xpose.msra.mxu1 %v1394_v43 }
 0x77d   : > { %v1334_v45 = vpop.permute.xlu0 %1333  ;;  %2550 = vmatprep.subr.bf16.mxu1 %v2795_v13 }
 0x77f   : > { %2535 = vmatmul.mubr.msk.bf16.vlgmr.msra.gmra.mrb[28].mxu0 %vm456_vm1, %v1334_v45 }
 0x780   : > { %2546 = vmatprep.mubr.msk.bf16.mxu0 %vm2796_vm2, %v2795_v13 }
 0x781   : > { %v1386_v46 = vpop.permute.xlu1 %1385 }
 0x783   : > { %2541 = vmatmul.mubr.msk.bf16.vlgmr.msra.gmra.mrb[20].mxu1 %vm456_vm1, %v1386_v46 }
 0x784   : > { %2552 = vmatprep.mubr.msk.bf16.mxu1 %vm2796_vm2, %v2795_v13 }
 0x819   : > { %v1219_v48 = vpop.f32.mrb[24].mxu0 }
 0x81a   : > { %v3136_v49 = vadd.f32 %v1275_v29, %v1219_v48  ;;  %v2522_v50 = vpop.f32.mrb[25].mxu0 }
 0x81b   : > { %v1222_v53 = vpop.f32.mrb[26].mxu0 }
 0x81c   : > { %v3138_v54 = vadd.f32 %v1278_v31, %v1222_v53  ;;  %v2523_v55 = vpop.f32.mrb[27].mxu0 }
 0x852   : > { %v1378_v56 = vpop.f32.mrb[28].mxu0 }
 0x853   : > { %v1436_v57 = vmul.f32 8.0, %v1378_v56  ;;  %v2536_v47 = vpop.f32.mrb[29].mxu0 }
 0x854   : > { %v1381_v51 = vpop.f32.mrb[30].mxu0 }
 0x855   : > { %v2537_v52 = vpop.f32.mrb[31].mxu0  ;;  %v1438_v59 = vsel %vm768_vm4, %v1436_v57, -inf }
 0x856   : > { %v1430_v60 = vpop.f32.mrb[20].mxu1  ;;  %1439 = vmax.xlane.f32.xlu0 %v1438_v59 }
 0x857   : > { %v1437_v61 = vmul.f32 8.0, %v1430_v60  ;;  %v2542_v62 = vpop.f32.mrb[21].mxu1 }
 0x858   : > { %v1433_v63 = vpop.f32.mrb[22].mxu1 }
 0x859   : > { %v2543_v0 = vpop.f32.mrb[23].mxu1  ;;  %v1441_v1 = vsel %vm768_vm4, %v1437_v61, -inf }
 0x85a   : > { %1442 = vmax.xlane.f32.xlu1 %v1441_v1 }
 0x86b   : > { %1510 = vrot.lane.b32.xlu1 %v3011_v14, %s2799_s21 }
 0x86f   : > { %1640 = vrot.lane.b32.xlu1 %v2955_v37, %s2798_s11 }
 0x873   : > { %1642 = vrot.lane.b32.xlu1 %v2965_v41, %s2798_s11 }
 0x877   : > { %1619 = vrot.lane.b32.xlu1 %v2971_v44, %s2798_s11 }
 0x8e3   : > { %v1440_v3 = vpop.xlane.xlu0 %1439 }
 0x8e4   : > { %v1444_v4 = vsub.f32 %v1436_v57, %v1440_v3 }
 0x8e6   : > { %v1446_v7 = vmul.f32 1.442695, %v1444_v4 }
 0x8e7   : > { %v1443_v5 = vpop.xlane.xlu1 %1442 }
 0x8e8   : > { %v1445_v6 = vsub.f32 %v1437_v61, %v1443_v5 }
 0x8ea   : > { %v1448_v8 = vmul.f32 1.442695, %v1445_v6 }
 0x8eb   : > { %v1511_v10 = vpop.permute.xlu1 %1510 }
 0x8ec   : > { %2718 = vpow2.f32 %v1448_v8  ;;  %v1516_v11 = vsel %vm796_vm3, %v1511_v10, 0 }
 0x8ed   : > { %2551 = vmatpush3.bf16.msra.mxu1 %v1516_v11  ;;  %2720 = vpow2.f32 %v1446_v7 }
 0x8ee   : > { %2564 = vmatprep.subr.bf16.mxu1 %v2795_v13 }
 0x8ef   : > { %v1641_v37 = vpop.permute.xlu1 %1640 }
 0x8f0   : > { %v1646_v18 = vsel %vm456_vm1, %v1641_v37, 0.0 }
 0x8f3   : > { %v1643_v12 = vpop.permute.xlu1 %1642 }
 0x8f4   : > { %v1649_v41 = vsel %vm456_vm1, %v1643_v12, 0.0 }
 0x8f5   : > { %1650 = vadd.xlane.f32.xlu1 %v1649_v41 }
 0x8f6   : > { %v2719_v44 = vpop.eup %2718 }
 0x8f7   : > { %v1453_v15 = vsel %vm768_vm4, %v2719_v44, 0.0  ;;  %v2721_v16 = vpop.eup %2720 }
 0x8f8   : > { %1454 = vadd.xlane.f32.xlu0 %v1453_v15  ;;  %v1450_v17 = vsel %vm768_vm4, %v2721_v16, 0.0 }
 0x8fc   : > { %1451 = vadd.xlane.f32.xlu0 %v1450_v17 }
 0x906   : > { %1635 = vrot.lane.b32.xlu1 %v2999_v2, %s2797_s14 }
 0x912   : > { %1462 = vrot.lane.b32.xlu0 %v3006_v9, %s2799_s21 }
 0x916   : > { %1617 = vrot.lane.b32.xlu0 %v2949_v35, %s2798_s11  ;;  %v1620_v35 = vpop.permute.xlu1 %1619 }
 0x917   : > { %v1626_v30 = vsel %vm456_vm1, %v1620_v35, 0.0 }
 0x935   : > { %1647 = vadd.xlane.f32.xlu0 %v1646_v18 }
 0x982   : > { %v1651_v42 = vpop.xlane.xlu1 %1650 }
 0x983   : > { %v1653_v45 = vmax.f32 %v1651_v42, 1e-24 }
 0x985   : > { %v1455_v19 = vpop.xlane.xlu0 %1454 }
 0x986   : > { %2722 = vrcp.f32 %v1455_v19  ;;  %v1636_v61 = vpop.permute.xlu1 %1635 }
 0x989   : > { %v1452_v20 = vpop.xlane.xlu0 %1451 }
 0x98a   : > { %2724 = vrcp.f32 %v1452_v20 }
 0x98d   : > { %v1463_v21 = vpop.permute.xlu0 %1462 }
 0x98e   : > { %v1468_v23 = vsel %vm796_vm3, %v1463_v21, 0 }
 0x98f   : > { %2545 = vmatpush3.bf16.msra.mxu0 %v1468_v23 }
 0x990   : > { %v2723_v24 = vpop.eup %2722  ;;  %2556 = vmatprep.subr.bf16.mxu0 %v2795_v13 }
 0x991   : > { %v1459_v2 = vmul.f32 %v2723_v24, %v2719_v44  ;;  %v1618_v25 = vpop.permute.xlu0 %1617 }
 0x992   : > { %v1623_v26 = vsel %vm456_vm1, %v1618_v25, 0.0 }
 0x993   : > { %1624 = vadd.xlane.f32.xlu0 %v1623_v26  ;;  %v1461_v27 = vpack.c.bf16 %v1459_v2, %v1459_v2 }
 0x994   : > { %v2725_v28 = vpop.eup %2724 }
 0x995   : > { %v1458_v29 = vmul.f32 %v2725_v28, %v2721_v16  ;;  %2553 = vmatmul.mubr.msk.bf16.vlgmr.msra.gmra.mrb[24].mxu1 %vm768_vm4, %v1461_v27 }
 0x996   : > { %2566 = vmatprep.mubr.msk.bf16.mxu1 %vm2796_vm2, %v2795_v13 }
 0x997   : > { %1627 = vadd.xlane.f32.xlu0 %v1626_v30  ;;  %v1460_v31 = vpack.c.bf16 %v1458_v29, %v1458_v29 }
 0x999   : > { %2547 = vmatmul.mubr.msk.bf16.vlgmr.msra.gmra.mrb[32].mxu0 %vm768_vm4, %v1460_v31 }
 0x99a   : > { %2560 = vmatprep.mubr.msk.bf16.mxu0 %vm2796_vm2, %v2795_v13  ;;  %2557 = vmatpush3.bf16.msra.mxu0 %v2660_v32 }
 0x99b   : > { %2558 = vmatprep.subr.bf16.mxu0 %v2795_v13 }
 0x99e   : > { %2559 = vmatpush3.bf16.msra.mxu0 %v2661_v39 }
 0x99f   : > { %2570 = vmatprep.subr.bf16.mxu0 %v2795_v13 }
 0x9ad   : > { %1658 = vrot.lane.b32.xlu0 %v2988_v58, %s2797_s14 }
 0x9c2   : > { %v1648_v40 = vpop.xlane.xlu0 %1647 }
 0x9c3   : > { %v1652_v43 = vmax.f32 %v1648_v40, 1e-24 }
 0x9c5   : > { %2726 = vrsqrt.f32 %v1652_v43 }
 0x9c6   : > { %2728 = vrsqrt.f32 %v1653_v45 }
 0x9cf   : > { %v2727_v50 = vpop.eup %2726 }
 0x9d0   : > { %v2729_v55 = vpop.eup %2728  ;;  %v1656_v56 = vmul.f32 %v2727_v50, %v2945_v34 }
 0x9d1   : > { %v1657_v47 = vmul.f32 %v2729_v55, %v2957_v38 }
 0xa20   : > { %v1625_v46 = vpop.xlane.xlu0 %1624 }
 0xa21   : > { %v1629_v48 = vmax.f32 %v1625_v46, 1e-24 }
 0xa23   : > { %2730 = vrsqrt.f32 %v1629_v48 }
 0xa24   : > { %v1628_v53 = vpop.xlane.xlu0 %1627 }
 0xa25   : > { %v1630_v58 = vmax.f32 %v1628_v53, 1e-24 }
 0xa27   : > { %2732 = vrsqrt.f32 %v1630_v58 }
 0xa28   : > { %v1659_v57 = vpop.permute.xlu0 %1658 }
 0xa29   : > { %v1661_v51 = vmul.f32 %v1659_v57, %v1656_v56  ;;  %v1662_v52 = vmul.f32 %v1659_v57, %v1657_v47 }
 0xa2b   : > { %v1665_v59 = vpack.c.bf16 %v1661_v51, %v1661_v51  ;;  %v1666_v63 = vpack.c.bf16 %v1662_v52, %v1662_v52 }
 0xa2d   : > { %v2731_v60 = vpop.eup %2730  ;;  %1671 = vrot.lane.b32.xlu1 %v1665_v59, %s2798_s11 }
 0xa2e   : > { %v1633_v62 = vmul.f32 %v2731_v60, %v2943_v33 }
 0xa30   : > { %v1638_v0 = vmul.f32 %v1636_v61, %v1633_v62 }
 0xa31   : > { %v2733_v1 = vpop.eup %2732  ;;  %1723 = vrot.lane.b32.xlu1 %v1666_v63, %s2798_s11  ;;  %v2662_v63 = vld [vmem:[%s2889_s28 + $0x30] sm:$0xff]  }
 0xa32   : > { %v1634_v3 = vmul.f32 %v2733_v1, %v2951_v36  ;;  %v1663_v34 = vpack.c.bf16 %v1638_v0, %v1638_v0  ;;  %v2663_v0 = vld [vmem:[%s2889_s28 + $0x38] sm:$0xff]  }
 0xa34   : > { %v1639_v4 = vmul.f32 %v1636_v61, %v1634_v3  ;;  %1668 = vrot.lane.b32.xlu0 %v1663_v34, %s2798_s11 }
 0xa36   : > { %v1664_v38 = vpack.c.bf16 %v1639_v4, %v1639_v4 }
 0xa38   : > { %1720 = vrot.lane.b32.xlu1 %v1664_v38, %s2798_s11 }
 0xa68   : > { %v1552_v5 = vpop.f32.mrb[24].mxu1 }
 0xa69   : > { %v2554_v6 = vpop.f32.mrb[25].mxu1 }
 0xa6a   : > { %v1555_v7 = vpop.f32.mrb[26].mxu1 }
 0xa6b   : > { %v2555_v8 = vpop.f32.mrb[27].mxu1 }
 0xa6c   : > { %v1504_v10 = vpop.f32.mrb[32].mxu0 }
 0xa6d   : > { %v1558_v33 = vpack.c.bf16 %v1552_v5, %v1504_v10  ;;  %v2548_v11 = vpop.f32.mrb[33].mxu0 }
 0xa6e   : > { %v1507_v37 = vpop.f32.mrb[34].mxu0 }
 0xa6f   : > { %v2549_v12 = vpop.f32.mrb[35].mxu0  ;;  %2561 = vmatmul.mubr.msk.bf16.vlgmr.msra.gmra.mrb[36].mxu0 %vm456_vm1, %v1558_v33 }
 0xa70   : > { %2572 = vmatprep.mubr.msk.bf16.mxu0 %vm2796_vm2, %v2795_v13  ;;  %v2754_v12 = vld [vmem:[#allocation2] sm:$0xff] }
 0xa9f   : > { %v1672_v36 = vpop.permute.xlu1 %1671 }
 0xaa0   : > { %v1677_v41 = vsel %vm456_vm1, %v1672_v36, 0 }
 0xaa1   : > { %2565 = vmatpush3.bf16.xpose.msra.mxu1 %v1677_v41 }
 0xaa2   : > { %2576 = vmatprep.subr.bf16.mxu1 %v2795_v13 }
 0xaa3   : > { %v1724_v44 = vpop.permute.xlu1 %1723 }
 0xaa4   : > { %v1729_v15 = vsel %vm456_vm1, %v1724_v44, 0 }
 0xaa5   : > { %2571 = vmatpush3.bf16.xpose.msra.mxu0 %v1729_v15  ;;  %v2755_v15 = vld [vmem:[#allocation2 + $0x8] sm:$0xff] }
 0xaa6   : > { %v1669_v16 = vpop.permute.xlu0 %1668  ;;  %2582 = vmatprep.subr.bf16.mxu0 %v2795_v13 }
 0xaa8   : > { %2567 = vmatmul.mubr.msk.bf16.vlgmr.msra.gmra.mrb[28].mxu1 %vm456_vm1, %v1669_v16 }
 0xaa9   : > { %2578 = vmatprep.mubr.msk.bf16.mxu1 %vm2796_vm2, %v2795_v13 }
 0xaaa   : > { %v1721_v17 = vpop.permute.xlu1 %1720 }
 0xaac   : > { %2573 = vmatmul.mubr.msk.bf16.vlgmr.msra.gmra.mrb[40].mxu0 %vm456_vm1, %v1721_v17 }
 0xaad   : > { %2584 = vmatprep.mubr.msk.bf16.mxu0 %vm2796_vm2, %v2795_v13 }
 0xb42   : > { %v1608_v18 = vpop.f32.mrb[36].mxu0 }
 0xb43   : > { %v3200_v19 = vadd.f32 %v1608_v18, %v3136_v49  ;;  %v2562_v20 = vpop.f32.mrb[37].mxu0 }
 0xb44   : > { %v1611_v21 = vpop.f32.mrb[38].mxu0 }
 0xb45   : > { %v3203_v23 = vadd.f32 %v1611_v21, %v3138_v54  ;;  %v2563_v24 = vpop.f32.mrb[39].mxu0  ;;  %v2664_v21 = vld [vmem:[%s2895_s16] sm:$0xff]  }
 0xb7b   : > { %v1713_v2 = vpop.f32.mrb[28].mxu1 }
 0xb7c   : > { %v1771_v25 = vmul.f32 8.0, %v1713_v2  ;;  %v2568_v26 = vpop.f32.mrb[29].mxu1 }
 0xb7d   : > { %v1716_v35 = vpop.f32.mrb[30].mxu1 }
 0xb7e   : > { %v2569_v27 = vpop.f32.mrb[31].mxu1  ;;  %v1773_v28 = vsel %vm768_vm4, %v1771_v25, -inf }
 0xb7f   : > { %1774 = vmax.xlane.f32.xlu0 %v1773_v28  ;;  %v1765_v29 = vpop.f32.mrb[40].mxu0 }
 0xb80   : > { %v1772_v30 = vmul.f32 8.0, %v1765_v29  ;;  %v2574_v31 = vpop.f32.mrb[41].mxu0 }
 0xb81   : > { %v1768_v32 = vpop.f32.mrb[42].mxu0 }
 0xb82   : > { %v2575_v49 = vpop.f32.mrb[43].mxu0  ;;  %v1776_v39 = vsel %vm768_vm4, %v1772_v30, -inf }
 0xb83   : > { %1777 = vmax.xlane.f32.xlu1 %v1776_v39  ;;  %v2666_v49 = vld [vmem:[%s2900_s20] sm:$0xff]   ;;  %v2667_v39 = vld [vmem:[%s2900_s20 + $0x8] sm:$0xff]  }
 0xb94   : > { %1845 = vrot.lane.b32.xlu1 %v3011_v14, %s2798_s11 }
 0xc0c   : > { %v1775_v54 = vpop.xlane.xlu0 %1774 }
 0xc0d   : > { %v1779_v40 = vsub.f32 %v1771_v25, %v1775_v54  ;;  %v2668_v54 = vld [vmem:[%s2900_s20 + $0x10] sm:$0xff]  }
 0xc0f   : > { %v1781_v42 = vmul.f32 1.442695, %v1779_v40  ;;  %v2669_v40 = vld [vmem:[%s2900_s20 + $0x18] sm:$0xff]  }
 0xc10   : > { %v1778_v43 = vpop.xlane.xlu1 %1777 }
 0xc11   : > { %2734 = vpow2.f32 %v1781_v42  ;;  %v1780_v45 = vsub.f32 %v1772_v30, %v1778_v43  ;;  %v2670_v42 = vld [vmem:[%s2900_s20 + $0x20] sm:$0xff]   ;;  %v2671_v43 = vld [vmem:[%s2900_s20 + $0x28] sm:$0xff]  }
 0xc13   : > { %v1783_v46 = vmul.f32 1.442695, %v1780_v45  ;;  %v2672_v45 = vld [vmem:[%s2900_s20 + $0x30] sm:$0xff]  }
 0xc14   : > { %v1846_v48 = vpop.permute.xlu1 %1845 }
 0xc15   : > { %2736 = vpow2.f32 %v1783_v46  ;;  %v1851_v50 = vsel %vm796_vm3, %v1846_v48, 0  ;;  %v2673_v46 = vld [vmem:[%s2900_s20 + $0x38] sm:$0xff]  }
 0xc16   : > { %2583 = vmatpush3.bf16.msra.mxu0 %v1851_v50 }
 0xc17   : > { %2596 = vmatprep.subr.bf16.mxu0 %v2795_v13 }
 0xc1b   : > { %v2735_v53 = vpop.eup %2734 }
 0xc1c   : > { %v1785_v58 = vsel %vm768_vm4, %v2735_v53, 0.0 }
 0xc1d   : > { %1786 = vadd.xlane.f32.xlu0 %v1785_v58 }
 0xc1f   : > { %v2737_v55 = vpop.eup %2736 }
 0xc20   : > { %v1788_v14 = vsel %vm768_vm4, %v2737_v55, 0.0 }
 0xc21   : > { %1789 = vadd.xlane.f32.xlu0 %v1788_v14 }
 0xc37   : > { %1797 = vrot.lane.b32.xlu0 %v3006_v9, %s2798_s11 }
 0xcaa   : > { %v1787_v56 = vpop.xlane.xlu0 %1786 }
 0xcab   : > { %2738 = vrcp.f32 %v1787_v56 }
 0xcae   : > { %v1790_v57 = vpop.xlane.xlu0 %1789 }
 0xcaf   : > { %2740 = vrcp.f32 %v1790_v57 }
 0xcb2   : > { %v1798_v47 = vpop.permute.xlu0 %1797 }
 0xcb3   : > { %v1803_v51 = vsel %vm796_vm3, %v1798_v47, 0 }
 0xcb4   : > { %2577 = vmatpush3.bf16.msra.mxu1 %v1803_v51  ;;  %v2383_v51 = vld.sshfl [vmem:[%s2906_s18] sm:$0x33 pattern:$0x75316420] }
 0xcb5   : > { %v2739_v52 = vpop.eup %2738  ;;  %2588 = vmatprep.subr.bf16.mxu1 %v2795_v13 }
 0xcb6   : > { %v1793_v59 = vmul.f32 %v2739_v52, %v2735_v53 }
 0xcb8   : > { %v1795_v60 = vpack.c.bf16 %v1793_v59, %v1793_v59  ;;  %v2054_v59 = vcombine.high %v2383_v51, %v2383_v51 }
 0xcb9   : > { %v2741_v61 = vpop.eup %2740 }
 0xcba   : > { %v1794_v62 = vmul.f32 %v2741_v61, %v2737_v55  ;;  %2579 = vmatmul.mubr.msk.bf16.vlgmr.msra.gmra.mrb[32].mxu1 %vm768_vm4, %v1795_v60  ;;  %v2057_v60 = vadd.f32 1.0, %v2383_v51 }
 0xcbb   : > { %2592 = vmatprep.mubr.msk.bf16.mxu1 %vm2796_vm2, %v2795_v13  ;;  %2589 = vmatpush3.bf16.msra.mxu1 %v2662_v63 }
 0xcbc   : > { %v1796_v9 = vpack.c.bf16 %v1794_v62, %v1794_v62  ;;  %2590 = vmatprep.subr.bf16.mxu1 %v2795_v13  ;;  %v2064_v61 = vrot.slane %v2057_v60, %v2930_v22  ;;  %v2073_v62 = vrot.slane %v2383_v51, 1 }
 0xcbe   : > { %2585 = vmatmul.mubr.msk.bf16.vlgmr.msra.gmra.mrb[44].mxu0 %vm768_vm4, %v1796_v9  ;;  %v2074_v9 = vrot.slane %v2054_v59, 1 }
 0xcbf   : > { %2600 = vmatprep.mubr.msk.bf16.mxu0 %vm2796_vm2, %v2795_v13  ;;  %2591 = vmatpush3.bf16.msra.mxu1 %v2663_v0 }
 0xcc0   : > { %2604 = vmatprep.subr.bf16.mxu1 %v2795_v13  ;;  %2597 = vmatpush3.bf16.msra.mxu0 %v2664_v21 }
 0xcc1   : > { %2598 = vmatprep.subr.bf16.mxu0 %v2795_v13 }
 0xd8d   : > { %v1839_v1 = vpop.f32.mrb[32].mxu1 }
 0xd8e   : > { %v2580_v3 = vpop.f32.mrb[33].mxu1 }
 0xd8f   : > { %v1842_v34 = vpop.f32.mrb[34].mxu1 }
 0xd90   : > { %v2581_v4 = vpop.f32.mrb[35].mxu1 }
 0xd91   : > { %v1887_v38 = vpop.f32.mrb[44].mxu0  ;;  %v2078_v4 = vrot.slane %v2073_v62, %v2930_v22 }
 0xd92   : > { %v1893_v5 = vpack.c.bf16 %v1887_v38, %v1839_v1  ;;  %v2586_v6 = vpop.f32.mrb[45].mxu0 }
 0xd93   : > { %v1890_v7 = vpop.f32.mrb[46].mxu0 }
 0xd94   : > { %v2587_v8 = vpop.f32.mrb[47].mxu0  ;;  %2593 = vmatmul.mubr.msk.bf16.vlgmr.msra.gmra.mrb[36].mxu1 %vm456_vm1, %v1893_v5  ;;  %v2082_v5 = vrot.slane %v2074_v9, %v2930_v22 }
 0xd95   : > { %2620 = vmatprep.mubr.msk.bf16.mxu1 %vm2796_vm2, %v2795_v13  ;;  %2605 = vmatpush3.bf16.msra.mxu1 %v2666_v49 }
 0xd96   : > { %2606 = vmatprep.subr.bf16.mxu1 %v2795_v13 }
 0xd99   : > { %2607 = vmatpush3.bf16.msra.mxu1 %v2667_v39 }
 0xd9a   : > { %2608 = vmatprep.subr.bf16.mxu1 %v2795_v13 }
 0xd9d   : > { %2609 = vmatpush3.bf16.msra.mxu1 %v2668_v54 }
 0xd9e   : > { %2610 = vmatprep.subr.bf16.mxu1 %v2795_v13 }
 0xda1   : > { %2611 = vmatpush3.bf16.msra.mxu1 %v2669_v40 }
 0xda2   : > { %2612 = vmatprep.subr.bf16.mxu1 %v2795_v13 }
 0xda5   : > { %2613 = vmatpush3.bf16.msra.mxu1 %v2670_v42 }
 0xda6   : > { %2614 = vmatprep.subr.bf16.mxu1 %v2795_v13 }
 0xda9   : > { %2615 = vmatpush3.bf16.msra.mxu1 %v2671_v43 }
 0xdaa   : > { %2616 = vmatprep.subr.bf16.mxu1 %v2795_v13 }
 0xdad   : > { %2617 = vmatpush3.bf16.msra.mxu1 %v2672_v45 }
 0xdae   : > { %2618 = vmatprep.subr.bf16.mxu1 %v2795_v13  ;;  %v2058_v13 = vadd.f32 1.0, %v2054_v59 }
 0xdb0   : > { %v2068_v1 = vrot.slane %v2058_v13, %v2930_v22 }
 0xdb1   : > { %2619 = vmatpush3.bf16.msra.mxu1 %v2673_v46 }
 0xe67   : > { %v1943_v10 = vpop.f32.mrb[36].mxu1 }
 0xe68   : > { %v1950_v33 = vadd.f32 %v1943_v10, %v3200_v19  ;;  %v2594_v11 = vpop.f32.mrb[37].mxu1 }
 0xe69   : > { %v1946_v37 = vpop.f32.mrb[38].mxu1 }
 0xe6a   : > { %v3231_v36 = vadd.f32 %v2754_v12, %v1950_v33  ;;  %v1951_v41 = vadd.f32 %v1946_v37, %v3203_v23  ;;  %v2595_v44 = vpop.f32.mrb[39].mxu1  ;;  %v2665_v23 = vld [vmem:[%s2895_s16 + $0x8] sm:$0xff]  }
 0xe6b   : > { %2599 = vmatpush3.bf16.msra.mxu0 %v2665_v23 }
 0xe6c   : > { %v3234_v16 = vadd.f32 %v2755_v15, %v1951_v41  ;;  %v1954_v17 = vmul.f32 %v3231_v36, %v3231_v36 }
 0xe6e   : > { %v1956_v18 = vsel %vm456_vm1, %v1954_v17, 0.0  ;;  %v1955_v19 = vmul.f32 %v3234_v16, %v3234_v16 }
 0xe6f   : > { %1957 = vadd.xlane.f32.xlu1 %v1956_v18 }
 0xe70   : > { %v1959_v20 = vsel %vm456_vm1, %v1955_v19, 0.0 }
 0xe71   : > { %1960 = vadd.xlane.f32.xlu0 %v1959_v20 }
 0xefc   : > { %v1958_v24 = vpop.xlane.xlu1 %1957 }
 0xefd   : > { %v1962_v2 = vmax.f32 %v1958_v24, 1e-24 }
 0xefe   : > { %v1961_v25 = vpop.xlane.xlu0 %1960 }
 0xeff   : > { %2742 = vrsqrt.f32 %v1962_v2  ;;  %v1963_v26 = vmax.f32 %v1961_v25, 1e-24 }
 0xf01   : > { %2744 = vrsqrt.f32 %v1963_v26 }
 0xf09   : > { %v2743_v35 = vpop.eup %2742 }
 0xf0a   : > { %v1966_v27 = vmul.f32 %v2743_v35, %v3231_v36 }
 0xf0b   : > { %v2745_v28 = vpop.eup %2744 }
 0xf0c   : > { %v1967_v29 = vmul.f32 %v2745_v28, %v3234_v16  ;;  %v1968_v30 = vmul.f32 5.656854, %v1966_v27 }
 0xf0e   : > { %v1969_v31 = vmul.f32 5.656854, %v1967_v29 }
 0xf10   : > { %v1970_v32 = vpack.c.bf16 %v1969_v31, %v1968_v30 }
 0xf12   : > { %2601 = vmatmul.mubr.msk.bf16.vlgmr.msra.gmra.mrb[48].mxu0 %vm456_vm1, %v1970_v32 }
 0xfe5   : > { %v2024_v48 = vpop.f32.mrb[48].mxu0 }
 0xfe6   : > { %v2381_v50 = vmul.f32 -1.442695, %v2024_v48  ;;  %v2602_v53 = vpop.f32.mrb[49].mxu0 }
 0xfe7   : > { %v2027_v58 = vpop.f32.mrb[50].mxu0 }
 0xfe8   : > { %2746 = vpow2.f32 %v2381_v50  ;;  %v2382_v55 = vmul.f32 -1.442695, %v2027_v58  ;;  %v2603_v14 = vpop.f32.mrb[51].mxu0 }
 0xfea   : > { %2748 = vpow2.f32 %v2382_v55 }
 0xff2   : > { %v2747_v56 = vpop.eup %2746 }
 0xff3   : > { %v2037_v57 = vadd.f32 1.0, %v2747_v56 }
 0xff4   : > { %v2749_v47 = vpop.eup %2748 }
 0xff5   : > { %2750 = vrcp.f32 %v2037_v57  ;;  %v2038_v52 = vadd.f32 1.0, %v2749_v47 }
 0xff7   : > { %2752 = vrcp.f32 %v2038_v52 }
 0xfff   : > { %v2751_v63 = vpop.eup %2750 }
0x1000   : > { %v2043_v0 = vmul.f32 %v2751_v63, %v2024_v48 }
0x1001   : > { %v2753_v3 = vpop.eup %2752 }
0x1002   : > { %v2071_v34 = vmul.f32 %v2064_v61, %v2043_v0  ;;  %v2044_v38 = vmul.f32 %v2753_v3, %v2027_v58 }
0x1004   : > { %v2072_v6 = vmul.f32 %v2068_v1, %v2044_v38  ;;  %v2085_v7 = vadd.f32 %v2078_v4, %v2071_v34 }
0x1006   : > { %v2086_v8 = vadd.f32 %v2082_v5, %v2072_v6 }
0x1008   : > { %v2087_v10 = vpack.c.bf16 %v2086_v8, %v2085_v7 }
0x100a   : > { %2621 = vmatmul.mubr.bf16.vlgmr.msra.gmra.mrb[40].mxu1 %v2087_v10 }
0x10dc   : > { %2200 = sbr.rel (%p2392_p5) target bundleno = 4323 (0x10e3), region = 64 }
0x10dd   : > { %v2186_v33 = vpop.f32.mrb[40].mxu1 }
0x10de   : > { %v2193_v11 = vadd.f32 %v2186_v33, %v3231_v36  ;;  %v2622_v37 = vpop.f32.mrb[41].mxu1 }
0x10df   : > { %v2189_v12 = vpop.f32.mrb[42].mxu1 }
0x10e0   : > { %2195 = vst.msk [vmem:[#allocation2] sm:$0xff] %vm456_vm1, %v2193_v11  ;;  %v2194_v41 = vadd.f32 %v2189_v12, %v3234_v16  ;;  %v2623_v44 = vpop.f32.mrb[43].mxu1  ;;  %2201 = vst.msk [vmem:[#allocation3] sm:$0xff] (!%p2392_p5), %vm456_vm1, %v2193_v11 }
0x10e2   : > { %2196 = vst.msk [vmem:[#allocation2 + $0x8] sm:$0xff] %vm456_vm1, %v2194_v41  ;;  %2202 = vst.msk [vmem:[#allocation3 + $0x8] sm:$0xff] (!%p2392_p5), %vm456_vm1, %v2194_v41 }
0x10e3 PF: > { %p2629_p6 = scmp.eq.s32.totalorder %s2859_s10, 1  ;;  %s2800_s18 = smov [#allocation3]  }
0x10e4   : > { %s2209_s28 = sshll.u32 %s2800_s18, 4  ;;  %s2210_s28 = int_to_ptr.vmem [resolvable:$true] %s2209_s28 }
0x10e5   : > { %s2756_s16 = scalar_lea.vmem %s2210_s28, 256  ;;  %p2763_p10 = scmp.lt.s32.totalorder %s2210_s28, %s2210_s28 }
0x10e6   : > { %p2757_p7 = scmp.ne.s32.totalorder %s2210_s28, %s2756_s16  ;;  %p2764_p11 = scmp.lt.s32.totalorder %s2756_s16, %s2756_s16 }
0x10e8   : > { %p2758_p8 = pnand %p2757_p7, %p2629_p6  ;;  %p2765_p12 = por %p2764_p11, %p2763_p10 }
0x10ea   : > { %p2759_p9 = pneg %p2758_p8 }
0x10ec   : > { %p2766_p13 = pnand %p2765_p12, %p2759_p9 }
0x10ee   : > { %2769 = shalt.err (!%p2766_p13)
}
0x10ef   : > { %s2770_s26 = scalar_lea.hbm %s3310_s9, 256 }
0x10f0   : > { %p2771_p0 = scmp.ne.s32.totalorder %s3310_s9, %s2770_s26  ;;  %p2776_p3 = scmp.lt.u32.totalorder %s2770_s26, %s3310_s9 }
0x10f2   : > { %p2772_p1 = pnand %p2771_p0, %p2629_p6 }
0x10f4   : > { %p2773_p2 = pneg %p2772_p1 }
0x10f6   : > { %p2778_p4 = pnand %p2776_p3, %p2773_p2 }
0x10f8   : > { %2781 = shalt.err (!%p2778_p4)
}
0x10f9   : > { %s2801_s13 = smov 128   ;;  %s2802_s14 = smov 8  }
0x10fa   : > { %2626 = dma.vmem_to_hbm [thread:$0]  (%p2629_p6), %s2210_s28, 256, %s3310_s9, [#allocation4], %s2801_s13, %s2801_s13, %s2802_s14  }
0x10fb   : > { %2787 = dma.done.wait (%p2629_p6), [#allocation4], 256  }
0x10fc   : > { %2789 = vsyncadd (%p2629_p6), [#allocation4], 4294967040 }
0x10fd PF: > { %s20_s30 = sadd.s32 1, %s2792_s30  }
0x10fe   : > { %p17_p5 = scmp.ge.s32.totalorder %s20_s30, 4  }
0x1100   :  { %19 = sbr.rel (!%p17_p5) target bundleno = 1 (0x1), region = 112 }
0x1107   :  { %2225 = vsyncpa [#allocation4], 1 }
0x1108   :  { %2227 = vsyncpa [#allocation4 + $0x1], 1 }

</bundles_post_ra>
